<compile_context>
chip_gen: v7x
topology: tpu7x:2x2x1
jax: 0.10.0
libtpu: 0.0.40
codegen_flags: <defaults>
</compile_context>

<pallas_src>
import jax
import jax.numpy as jnp
from jax.experimental import pallas as pl
from jax.experimental.pallas import tpu as pltpu

EPS = 1e-5
_VMEM_LIMIT = 32 * 1024 * 1024  # explicit scoped-VMEM budget (safe on v5e/v6e/v7x)


# -----------------------------------------------------------------------------
# Pass 1: per-channel sum / sum-of-squares of g1 = Wg@g + bg and x1 = Wx@x + bx
# -----------------------------------------------------------------------------
def _stats_kernel(g_ref, x_ref, wg_ref, bg_ref, wx_ref, bx_ref,
                  gs_ref, gq_ref, xs_ref, xq_ref):
    n = pl.program_id(0)
    t = pl.program_id(1)

    @pl.when(jnp.logical_and(n == 0, t == 0))
    def _init():
        gs_ref[...] = jnp.zeros_like(gs_ref)
        gq_ref[...] = jnp.zeros_like(gq_ref)
        xs_ref[...] = jnp.zeros_like(xs_ref)
        xq_ref[...] = jnp.zeros_like(xq_ref)

    g2 = g_ref[0]                                    # (F_g, hw_tile), lane-dense
    x2 = x_ref[0]                                    # (F_l, hw_tile)
    g1 = jnp.dot(wg_ref[...], g2, preferred_element_type=jnp.float32) + bg_ref[...]
    x1 = jnp.dot(wx_ref[...], x2, preferred_element_type=jnp.float32) + bx_ref[...]

    gs_ref[...] += jnp.sum(g1, axis=-1, keepdims=True)
    gq_ref[...] += jnp.sum(g1 * g1, axis=-1, keepdims=True)
    xs_ref[...] += jnp.sum(x1, axis=-1, keepdims=True)
    xq_ref[...] += jnp.sum(x1 * x1, axis=-1, keepdims=True)


# -----------------------------------------------------------------------------
# Pass 2: p_raw = wp . ReLU(BN(g1) + BN(x1)) + bp  (per pixel), plus its stats
# -----------------------------------------------------------------------------
def _psi_kernel(g_ref, x_ref, wg_ref, bg_ref, wx_ref, bx_ref,
                gsc_ref, gsh_ref, xsc_ref, xsh_ref, wp_ref, bp_ref,
                p_ref, ps_ref, pq_ref):
    n = pl.program_id(0)
    t = pl.program_id(1)

    @pl.when(jnp.logical_and(n == 0, t == 0))
    def _init():
        ps_ref[...] = jnp.zeros_like(ps_ref)
        pq_ref[...] = jnp.zeros_like(pq_ref)

    g2 = g_ref[0]
    x2 = x_ref[0]
    g1 = jnp.dot(wg_ref[...], g2, preferred_element_type=jnp.float32) + bg_ref[...]
    x1 = jnp.dot(wx_ref[...], x2, preferred_element_type=jnp.float32) + bx_ref[...]

    # BN folded into per-channel scale/shift (computed once on host from pass 1)
    r = jnp.maximum(g1 * gsc_ref[...] + gsh_ref[...] +
                    x1 * xsc_ref[...] + xsh_ref[...], 0.0)

    # psi 1x1 conv to a single channel: VPU multiply + cross-sublane reduce
    # (skips an MXU matmul whose output width would be 1).
    p_raw = jnp.sum(r * wp_ref[...], axis=0, keepdims=True) + bp_ref[...]  # (1, hw_tile)

    p_ref[0] = p_raw
    ps_ref[...] += jnp.sum(p_raw, axis=-1, keepdims=True)
    pq_ref[...] += jnp.sum(p_raw * p_raw, axis=-1, keepdims=True)


# -----------------------------------------------------------------------------
# Pass 3: out = x * sigmoid(p_raw * p_scale + p_shift)   (fully parallel)
# -----------------------------------------------------------------------------
def _gate_kernel(x_ref, p_ref, psc_ref, psh_ref, o_ref):
    psi = jax.nn.sigmoid(p_ref[0] * psc_ref[...] + psh_ref[...])   # (1, hw_tile)
    o_ref[0] = x_ref[0] * psi                                      # broadcast over channels


# -----------------------------------------------------------------------------
# Wrapper
# -----------------------------------------------------------------------------
def _pick_hw_tile(HW, max_c):
    budget = (4 * 1024 * 1024) // (4 * max(max_c, 1))   # keep each (C, hw) buffer ~<=4MiB
    for cand in (16384, 8192, 4096, 2048, 1024, 512, 256, 128):
        if cand <= HW and cand <= budget and HW % cand == 0:
            return cand
    return HW


def attention_block(g, x, params):
    """g: (N, F_g, H, W), x: (N, F_l, H, W) -> (N, F_l, H, W)."""
    N, F_g, H, W = g.shape
    _, F_l, _, _ = x.shape
    F_int = params["wg"].shape[0]
    HW = H * W
    P = N * HW
    f32 = jnp.float32

    # NCHW -> (N, C, HW): a pure reshape, no transpose / extra HBM pass.
    g3 = g.reshape(N, F_g, HW).astype(f32)
    x3 = x.reshape(N, F_l, HW).astype(f32)

    hw_tile = _pick_hw_tile(HW, max(F_g, F_l, F_int))
    T = HW // hw_tile

    wg = params["wg"].astype(f32)                       # (F_int, F_g)
    bg = params["bg"].reshape(F_int, 1).astype(f32)
    wx = params["wx"].astype(f32)                       # (F_int, F_l)
    bx = params["bx"].reshape(F_int, 1).astype(f32)
    wp = params["wp"].reshape(F_int, 1).astype(f32)     # (1, F_int) -> (F_int, 1)
    bp = params["bp"].reshape(1, 1).astype(f32)

    tile_map = lambda n, t: (n, 0, t)
    const_map = lambda n, t: (0, 0)

    seq_cp = pltpu.CompilerParams(
        dimension_semantics=("arbitrary", "arbitrary"),
        vmem_limit_bytes=_VMEM_LIMIT)
    par_cp = pltpu.CompilerParams(
        dimension_semantics=("parallel", "parallel"),
        vmem_limit_bytes=_VMEM_LIMIT)

    # ---------------- Pass 1: global BN statistics of g1 / x1 ----------------
    g_sum, g_sq, x_sum, x_sq = pl.pallas_call(
        _stats_kernel,
        grid=(N, T),
        in_specs=[
            pl.BlockSpec((1, F_g, hw_tile), tile_map),
            pl.BlockSpec((1, F_l, hw_tile), tile_map),
            pl.BlockSpec((F_int, F_g), const_map),
            pl.BlockSpec((F_int, 1), const_map),
            pl.BlockSpec((F_int, F_l), const_map),
            pl.BlockSpec((F_int, 1), const_map),
        ],
        out_specs=[pl.BlockSpec((F_int, 1), const_map)] * 4,
        out_shape=[jax.ShapeDtypeStruct((F_int, 1), f32)] * 4,
        compiler_params=seq_cp,
        cost_estimate=pl.CostEstimate(
            flops=int(2 * P * F_int * (F_g + F_l) + 4 * P * F_int),
            transcendentals=0,
            bytes_accessed=int(4 * P * (F_g + F_l))),
    )(g3, x3, wg, bg, wx, bx)

    # Fold train-mode BatchNorm into per-channel scale / shift (tiny XLA ops).
    inv_P = 1.0 / float(P)

    def fold(s, q, gamma, beta):
        mean = s * inv_P
        var = q * inv_P - mean * mean            # biased variance
        scale = gamma * jax.lax.rsqrt(var + EPS)
        return scale, beta - mean * scale

    g_scale, g_shift = fold(g_sum, g_sq,
                            params["gamma_g"].reshape(F_int, 1).astype(f32),
                            params["beta_g"].reshape(F_int, 1).astype(f32))
    x_scale, x_shift = fold(x_sum, x_sq,
                            params["gamma_x"].reshape(F_int, 1).astype(f32),
                            params["beta_x"].reshape(F_int, 1).astype(f32))

    # ---------------- Pass 2: psi pre-activation + its global stats ----------
    p_raw, p_sum, p_sq = pl.pallas_call(
        _psi_kernel,
        grid=(N, T),
        in_specs=[
            pl.BlockSpec((1, F_g, hw_tile), tile_map),
            pl.BlockSpec((1, F_l, hw_tile), tile_map),
            pl.BlockSpec((F_int, F_g), const_map),
            pl.BlockSpec((F_int, 1), const_map),
            pl.BlockSpec((F_int, F_l), const_map),
            pl.BlockSpec((F_int, 1), const_map),
            pl.BlockSpec((F_int, 1), const_map),   # g_scale
            pl.BlockSpec((F_int, 1), const_map),   # g_shift
            pl.BlockSpec((F_int, 1), const_map),   # x_scale
            pl.BlockSpec((F_int, 1), const_map),   # x_shift
            pl.BlockSpec((F_int, 1), const_map),   # wp
            pl.BlockSpec((1, 1), const_map),       # bp
        ],
        out_specs=[
            pl.BlockSpec((1, 1, hw_tile), tile_map),
            pl.BlockSpec((1, 1), const_map),
            pl.BlockSpec((1, 1), const_map),
        ],
        out_shape=[
            jax.ShapeDtypeStruct((N, 1, HW), f32),
            jax.ShapeDtypeStruct((1, 1), f32),
            jax.ShapeDtypeStruct((1, 1), f32),
        ],
        compiler_params=seq_cp,
        cost_estimate=pl.CostEstimate(
            flops=int(2 * P * F_int * (F_g + F_l) + 8 * P * F_int),
            transcendentals=0,
            bytes_accessed=int(4 * P * (F_g + F_l + 1))),
    )(g3, x3, wg, bg, wx, bx, g_scale, g_shift, x_scale, x_shift, wp, bp)

    p_scale, p_shift = fold(p_sum, p_sq,
                            params["gamma_p"].reshape(1, 1).astype(f32),
                            params["beta_p"].reshape(1, 1).astype(f32))

    # ---------------- Pass 3: gate the skip connection -----------------------
    out3 = pl.pallas_call(
        _gate_kernel,
        grid=(N, T),
        in_specs=[
            pl.BlockSpec((1, F_l, hw_tile), tile_map),
            pl.BlockSpec((1, 1, hw_tile), tile_map),
            pl.BlockSpec((1, 1), const_map),
            pl.BlockSpec((1, 1), const_map),
        ],
        out_specs=pl.BlockSpec((1, F_l, hw_tile), tile_map),
        out_shape=jax.ShapeDtypeStruct((N, F_l, HW), f32),
        compiler_params=par_cp,
        cost_estimate=pl.CostEstimate(
            flops=int(3 * P * F_l + 4 * P),
            transcendentals=int(P),
            bytes_accessed=int(4 * P * (2 * F_l + 1))),
    )(x3, p_raw, p_scale, p_shift)

    return out3.reshape(N, F_l, H, W)


# -----------------------------------------------------------------------------
# Pure-JAX reference (identical math, NCHW) and synthetic params
# -----------------------------------------------------------------------------
def attention_block_ref(g, x, params):
    def conv1x1(t, w, b):  # w: (Cout, Cin), b: (Cout,)
        return jnp.einsum("oc,nchw->nohw", w, t) + b[None, :, None, None]

    def bn(t, gamma, beta):  # training-mode BN over (N, H, W)
        mean = jnp.mean(t, axis=(0, 2, 3), keepdims=True)
        var = jnp.mean((t - mean) ** 2, axis=(0, 2, 3), keepdims=True)
        return ((t - mean) * jax.lax.rsqrt(var + EPS)
                * gamma[None, :, None, None] + beta[None, :, None, None])

    g1 = bn(conv1x1(g, params["wg"], params["bg"]), params["gamma_g"], params["beta_g"])
    x1 = bn(conv1x1(x, params["wx"], params["bx"]), params["gamma_x"], params["beta_x"])
    r = jnp.maximum(g1 + x1, 0.0)
    p = (r * params["wp"][0][None, :, None, None]).sum(axis=1, keepdims=True) \
        + params["bp"][None, :, None, None]
    p = bn(p, params["gamma_p"], params["beta_p"])
    return x * jax.nn.sigmoid(p)


def make_params(key, F_g, F_l, F_int):
    ks = jax.random.split(key, 6)
    f32 = jnp.float32
    return {
        "wg": jax.random.normal(ks[0], (F_int, F_g), f32) * 0.2,
        "bg": jax.random.normal(ks[1], (F_int,), f32) * 0.1,
        "gamma_g": jnp.full((F_int,), 1.1, f32),
        "beta_g": jnp.full((F_int,), 0.05, f32),
        "wx": jax.random.normal(ks[2], (F_int, F_l), f32) * 0.2,
        "bx": jax.random.normal(ks[3], (F_int,), f32) * 0.1,
        "gamma_x": jnp.full((F_int,), 0.9, f32),
        "beta_x": jnp.full((F_int,), -0.05, f32),
        "wp": jax.random.normal(ks[4], (1, F_int), f32) * 0.2,
        "bp": jax.random.normal(ks[5], (1,), f32) * 0.1,
        "gamma_p": jnp.full((1,), 1.2, f32),
        "beta_p": jnp.full((1,), 0.1, f32),
    }


if __name__ == "__main__":
    # Keep the XLA reference matmuls in full f32 so the comparison is apples-to-apples.
    jax.config.update("jax_default_matmul_precision", "highest")

    key = jax.random.PRNGKey(0)
    k_g, k_x, k_p = jax.random.split(key, 3)

    N, F_g, F_l, F_int, H, W = 2, 4, 4, 8, 16, 16
    g = jax.random.normal(k_g, (N, F_g, H, W), jnp.float32)
    x = jax.random.normal(k_x, (N, F_l, H, W), jnp.float32)
    params = make_params(k_p, F_g, F_l, F_int)

    out = jax.block_until_ready(jax.jit(attention_block)(g, x, params))
    ref = jax.block_until_ready(attention_block_ref(g, x, params))

    assert out.shape == (N, F_l, H, W)
    max_err = float(jnp.max(jnp.abs(out - ref)))
    assert max_err < 2e-3, f"Pallas kernel mismatch vs reference: max abs err {max_err}"
    print("KERNEL_OK")
</pallas_src>

<mosaic_0001>
module attributes {stable_mosaic.version = 11 : i64} {
  func.func @_stats_kernel(%arg0: i32, %arg1: i32, %arg2: memref<1x4x256xf32, #tpu.memory_space<vmem>>, %arg3: memref<1x4x256xf32, #tpu.memory_space<vmem>>, %arg4: memref<8x4xf32, #tpu.memory_space<vmem>>, %arg5: memref<8x1xf32, #tpu.memory_space<vmem>>, %arg6: memref<8x4xf32, #tpu.memory_space<vmem>>, %arg7: memref<8x1xf32, #tpu.memory_space<vmem>>, %arg8: memref<8x1xf32, #tpu.memory_space<vmem>>, %arg9: memref<8x1xf32, #tpu.memory_space<vmem>>, %arg10: memref<8x1xf32, #tpu.memory_space<vmem>>, %arg11: memref<8x1xf32, #tpu.memory_space<vmem>>) attributes {dimension_semantics = [#tpu.dimension_semantics<arbitrary>, #tpu.dimension_semantics<arbitrary>], iteration_bounds = array<i64: 2, 1>, scalar_prefetch = 0 : i64, scratch_operands = 0 : i64, tpu.core_type = #tpu.core_type<tc>, window_params = [{transform_indices = @transform_0, window_bounds = array<i64: 1, 4, 256>}, {transform_indices = @transform_1, window_bounds = array<i64: 1, 4, 256>}, {pipeline_mode = #tpu.pipeline_mode<synchronous>, transform_indices = @transform_2, window_bounds = array<i64: 8, 4>}, {pipeline_mode = #tpu.pipeline_mode<synchronous>, transform_indices = @transform_3, window_bounds = array<i64: 8, 1>}, {pipeline_mode = #tpu.pipeline_mode<synchronous>, transform_indices = @transform_4, window_bounds = array<i64: 8, 4>}, {pipeline_mode = #tpu.pipeline_mode<synchronous>, transform_indices = @transform_5, window_bounds = array<i64: 8, 1>}, {pipeline_mode = #tpu.pipeline_mode<synchronous>, transform_indices = @transform_6, window_bounds = array<i64: 8, 1>}, {pipeline_mode = #tpu.pipeline_mode<synchronous>, transform_indices = @transform_7, window_bounds = array<i64: 8, 1>}, {pipeline_mode = #tpu.pipeline_mode<synchronous>, transform_indices = @transform_8, window_bounds = array<i64: 8, 1>}, {pipeline_mode = #tpu.pipeline_mode<synchronous>, transform_indices = @transform_9, window_bounds = array<i64: 8, 1>}]} {
    %c0_i32 = arith.constant 0 : i32
    %0 = arith.cmpi eq, %arg0, %c0_i32 : i32
    %c0_i32_0 = arith.constant 0 : i32
    %1 = arith.cmpi eq, %arg1, %c0_i32_0 : i32
    %2 = arith.andi %0, %1 : i1
    %3 = arith.extui %2 : i1 to i32
    %c0_i32_1 = arith.constant 0 : i32
    %4 = arith.cmpi ne, %3, %c0_i32_1 : i32
    scf.if %4 {
      %cst_36 = arith.constant 0.000000e+00 : f32
      %41 = vector.broadcast %cst_36 : f32 to vector<8x1xf32>
      %c0_37 = arith.constant 0 : index
      %c0_38 = arith.constant 0 : index
      %42 = vector.load %arg8[%c0_37, %c0_38] : memref<8x1xf32, #tpu.memory_space<vmem>>, vector<8x1xf32>
      tpu.vector_store %arg8[%c0_37, %c0_38], %41 {strides = array<i32>} : memref<8x1xf32, #tpu.memory_space<vmem>>, vector<8x1xf32>,
      %cst_39 = arith.constant 0.000000e+00 : f32
      %43 = vector.broadcast %cst_39 : f32 to vector<8x1xf32>
      %c0_40 = arith.constant 0 : index
      %c0_41 = arith.constant 0 : index
      %44 = vector.load %arg9[%c0_40, %c0_41] : memref<8x1xf32, #tpu.memory_space<vmem>>, vector<8x1xf32>
      tpu.vector_store %arg9[%c0_40, %c0_41], %43 {strides = array<i32>} : memref<8x1xf32, #tpu.memory_space<vmem>>, vector<8x1xf32>,
      %cst_42 = arith.constant 0.000000e+00 : f32
      %45 = vector.broadcast %cst_42 : f32 to vector<8x1xf32>
      %c0_43 = arith.constant 0 : index
      %c0_44 = arith.constant 0 : index
      %46 = vector.load %arg10[%c0_43, %c0_44] : memref<8x1xf32, #tpu.memory_space<vmem>>, vector<8x1xf32>
      tpu.vector_store %arg10[%c0_43, %c0_44], %45 {strides = array<i32>} : memref<8x1xf32, #tpu.memory_space<vmem>>, vector<8x1xf32>,
      %cst_45 = arith.constant 0.000000e+00 : f32
      %47 = vector.broadcast %cst_45 : f32 to vector<8x1xf32>
      %c0_46 = arith.constant 0 : index
      %c0_47 = arith.constant 0 : index
      %48 = vector.load %arg11[%c0_46, %c0_47] : memref<8x1xf32, #tpu.memory_space<vmem>>, vector<8x1xf32>
      tpu.vector_store %arg11[%c0_46, %c0_47], %47 {strides = array<i32>} : memref<8x1xf32, #tpu.memory_space<vmem>>, vector<8x1xf32>,
    } else {
    }
    %c0 = arith.constant 0 : index
    %c0_2 = arith.constant 0 : index
    %c0_3 = arith.constant 0 : index
    %5 = vector.load %arg2[%c0, %c0_2, %c0_3] : memref<1x4x256xf32, #tpu.memory_space<vmem>>, vector<1x4x256xf32>
    %6 = vector.shape_cast %5 : vector<1x4x256xf32> to vector<4x256xf32>
    %c0_4 = arith.constant 0 : index
    %c0_5 = arith.constant 0 : index
    %c0_6 = arith.constant 0 : index
    %7 = vector.load %arg3[%c0_4, %c0_5, %c0_6] : memref<1x4x256xf32, #tpu.memory_space<vmem>>, vector<1x4x256xf32>
    %8 = vector.shape_cast %7 : vector<1x4x256xf32> to vector<4x256xf32>
    %c0_7 = arith.constant 0 : index
    %c0_8 = arith.constant 0 : index
    %9 = vector.load %arg4[%c0_7, %c0_8] : memref<8x4xf32, #tpu.memory_space<vmem>>, vector<8x4xf32>
    %cst = arith.constant dense<0.000000e+00> : vector<8x256xf32>
    %10 = tpu.matmul %9, %6, %cst {dimension_numbers = #tpu.dot_dimension_numbers<[1], [0], [0], [1], [0, 0, 1, 1], [], []>, precision = #tpu.contract_precision<fp32>} : vector<8x4xf32>, vector<4x256xf32>, vector<8x256xf32> -> vector<8x256xf32>
    %c0_9 = arith.constant 0 : index
    %c0_10 = arith.constant 0 : index
    %11 = vector.load %arg5[%c0_9, %c0_10] : memref<8x1xf32, #tpu.memory_space<vmem>>, vector<8x1xf32>
    %12 = vector.broadcast %11 : vector<8x1xf32> to vector<8x256xf32>
    %13 = arith.addf %10, %12 : vector<8x256xf32>
    %c0_11 = arith.constant 0 : index
    %c0_12 = arith.constant 0 : index
    %14 = vector.load %arg6[%c0_11, %c0_12] : memref<8x4xf32, #tpu.memory_space<vmem>>, vector<8x4xf32>
    %cst_13 = arith.constant dense<0.000000e+00> : vector<8x256xf32>
    %15 = tpu.matmul %14, %8, %cst_13 {dimension_numbers = #tpu.dot_dimension_numbers<[1], [0], [0], [1], [0, 0, 1, 1], [], []>, precision = #tpu.contract_precision<fp32>} : vector<8x4xf32>, vector<4x256xf32>, vector<8x256xf32> -> vector<8x256xf32>
    %c0_14 = arith.constant 0 : index
    %c0_15 = arith.constant 0 : index
    %16 = vector.load %arg7[%c0_14, %c0_15] : memref<8x1xf32, #tpu.memory_space<vmem>>, vector<8x1xf32>
    %17 = vector.broadcast %16 : vector<8x1xf32> to vector<8x256xf32>
    %18 = arith.addf %15, %17 : vector<8x256xf32>
    %c0_16 = arith.constant 0 : index
    %c0_17 = arith.constant 0 : index
    %19 = vector.load %arg8[%c0_16, %c0_17] : memref<8x1xf32, #tpu.memory_space<vmem>>, vector<8x1xf32>
    %cst_18 = arith.constant dense<0.000000e+00> : vector<8xf32>
    %20 = vector.multi_reduction <add>, %13, %cst_18 [1] : vector<8x256xf32> to vector<8xf32>
    %21 = vector.shape_cast %20 : vector<8xf32> to vector<8x1xf32>
    %22 = arith.addf %19, %21 : vector<8x1xf32>
    %c0_19 = arith.constant 0 : index
    %c0_20 = arith.constant 0 : index
    %23 = vector.load %arg8[%c0_19, %c0_20] : memref<8x1xf32, #tpu.memory_space<vmem>>, vector<8x1xf32>
    tpu.vector_store %arg8[%c0_19, %c0_20], %22 {strides = array<i32>} : memref<8x1xf32, #tpu.memory_space<vmem>>, vector<8x1xf32>,
    %c0_21 = arith.constant 0 : index
    %c0_22 = arith.constant 0 : index
    %24 = vector.load %arg9[%c0_21, %c0_22] : memref<8x1xf32, #tpu.memory_space<vmem>>, vector<8x1xf32>
    %25 = arith.mulf %13, %13 : vector<8x256xf32>
    %cst_23 = arith.constant dense<0.000000e+00> : vector<8xf32>
    %26 = vector.multi_reduction <add>, %25, %cst_23 [1] : vector<8x256xf32> to vector<8xf32>
    %27 = vector.shape_cast %26 : vector<8xf32> to vector<8x1xf32>
    %28 = arith.addf %24, %27 : vector<8x1xf32>
    %c0_24 = arith.constant 0 : index
    %c0_25 = arith.constant 0 : index
    %29 = vector.load %arg9[%c0_24, %c0_25] : memref<8x1xf32, #tpu.memory_space<vmem>>, vector<8x1xf32>
    tpu.vector_store %arg9[%c0_24, %c0_25], %28 {strides = array<i32>} : memref<8x1xf32, #tpu.memory_space<vmem>>, vector<8x1xf32>,
    %c0_26 = arith.constant 0 : index
    %c0_27 = arith.constant 0 : index
    %30 = vector.load %arg10[%c0_26, %c0_27] : memref<8x1xf32, #tpu.memory_space<vmem>>, vector<8x1xf32>
    %cst_28 = arith.constant dense<0.000000e+00> : vector<8xf32>
    %31 = vector.multi_reduction <add>, %18, %cst_28 [1] : vector<8x256xf32> to vector<8xf32>
    %32 = vector.shape_cast %31 : vector<8xf32> to vector<8x1xf32>
    %33 = arith.addf %30, %32 : vector<8x1xf32>
    %c0_29 = arith.constant 0 : index
    %c0_30 = arith.constant 0 : index
    %34 = vector.load %arg10[%c0_29, %c0_30] : memref<8x1xf32, #tpu.memory_space<vmem>>, vector<8x1xf32>
    tpu.vector_store %arg10[%c0_29, %c0_30], %33 {strides = array<i32>} : memref<8x1xf32, #tpu.memory_space<vmem>>, vector<8x1xf32>,
    %c0_31 = arith.constant 0 : index
    %c0_32 = arith.constant 0 : index
    %35 = vector.load %arg11[%c0_31, %c0_32] : memref<8x1xf32, #tpu.memory_space<vmem>>, vector<8x1xf32>
    %36 = arith.mulf %18, %18 : vector<8x256xf32>
    %cst_33 = arith.constant dense<0.000000e+00> : vector<8xf32>
    %37 = vector.multi_reduction <add>, %36, %cst_33 [1] : vector<8x256xf32> to vector<8xf32>
    %38 = vector.shape_cast %37 : vector<8xf32> to vector<8x1xf32>
    %39 = arith.addf %35, %38 : vector<8x1xf32>
    %c0_34 = arith.constant 0 : index
    %c0_35 = arith.constant 0 : index
    %40 = vector.load %arg11[%c0_34, %c0_35] : memref<8x1xf32, #tpu.memory_space<vmem>>, vector<8x1xf32>
    tpu.vector_store %arg11[%c0_34, %c0_35], %39 {strides = array<i32>} : memref<8x1xf32, #tpu.memory_space<vmem>>, vector<8x1xf32>,
    return
  }
  func.func @transform_0(%arg0: i32, %arg1: i32) -> (i32, i32, i32) {
    %c0_i32 = arith.constant 0 : i32
    %c0_i32_0 = arith.constant 0 : i32
    return %arg0, %c0_i32, %arg1 : i32, i32, i32
  }
  func.func @transform_1(%arg0: i32, %arg1: i32) -> (i32, i32, i32) {
    %c0_i32 = arith.constant 0 : i32
    %c0_i32_0 = arith.constant 0 : i32
    return %arg0, %c0_i32, %arg1 : i32, i32, i32
  }
  func.func @transform_2(%arg0: i32, %arg1: i32) -> (i32, i32) {
    %c0_i32 = arith.constant 0 : i32
    %c0_i32_0 = arith.constant 0 : i32
    %c0_i32_1 = arith.constant 0 : i32
    return %c0_i32, %c0_i32_0 : i32, i32
  }
  func.func @transform_3(%arg0: i32, %arg1: i32) -> (i32, i32) {
    %c0_i32 = arith.constant 0 : i32
    %c0_i32_0 = arith.constant 0 : i32
    %c0_i32_1 = arith.constant 0 : i32
    return %c0_i32, %c0_i32_0 : i32, i32
  }
  func.func @transform_4(%arg0: i32, %arg1: i32) -> (i32, i32) {
    %c0_i32 = arith.constant 0 : i32
    %c0_i32_0 = arith.constant 0 : i32
    %c0_i32_1 = arith.constant 0 : i32
    return %c0_i32, %c0_i32_0 : i32, i32
  }
  func.func @transform_5(%arg0: i32, %arg1: i32) -> (i32, i32) {
    %c0_i32 = arith.constant 0 : i32
    %c0_i32_0 = arith.constant 0 : i32
    %c0_i32_1 = arith.constant 0 : i32
    return %c0_i32, %c0_i32_0 : i32, i32
  }
  func.func @transform_6(%arg0: i32, %arg1: i32) -> (i32, i32) {
    %c0_i32 = arith.constant 0 : i32
    %c0_i32_0 = arith.constant 0 : i32
    %c0_i32_1 = arith.constant 0 : i32
    return %c0_i32, %c0_i32_0 : i32, i32
  }
  func.func @transform_7(%arg0: i32, %arg1: i32) -> (i32, i32) {
    %c0_i32 = arith.constant 0 : i32
    %c0_i32_0 = arith.constant 0 : i32
    %c0_i32_1 = arith.constant 0 : i32
    return %c0_i32, %c0_i32_0 : i32, i32
  }
  func.func @transform_8(%arg0: i32, %arg1: i32) -> (i32, i32) {
    %c0_i32 = arith.constant 0 : i32
    %c0_i32_0 = arith.constant 0 : i32
    %c0_i32_1 = arith.constant 0 : i32
    return %c0_i32, %c0_i32_0 : i32, i32
  }
  func.func @transform_9(%arg0: i32, %arg1: i32) -> (i32, i32) {
    %c0_i32 = arith.constant 0 : i32
    %c0_i32_0 = arith.constant 0 : i32
    %c0_i32_1 = arith.constant 0 : i32
    return %c0_i32, %c0_i32_0 : i32, i32
  }
}

module attributes {stable_mosaic.version = 11 : i64} {
  func.func @_gate_kernel(%arg0: i32, %arg1: i32, %arg2: memref<1x4x256xf32, #tpu.memory_space<vmem>>, %arg3: memref<1x1x256xf32, #tpu.memory_space<vmem>>, %arg4: memref<1x1xf32, #tpu.memory_space<vmem>>, %arg5: memref<1x1xf32, #tpu.memory_space<vmem>>, %arg6: memref<1x4x256xf32, #tpu.memory_space<vmem>>) attributes {dimension_semantics = [#tpu.dimension_semantics<parallel>, #tpu.dimension_semantics<parallel>], iteration_bounds = array<i64: 2, 1>, scalar_prefetch = 0 : i64, scratch_operands = 0 : i64, tpu.core_type = #tpu.core_type<tc>, window_params = [{transform_indices = @transform_0, window_bounds = array<i64: 1, 4, 256>}, {transform_indices = @transform_1, window_bounds = array<i64: 1, 1, 256>}, {pipeline_mode = #tpu.pipeline_mode<synchronous>, transform_indices = @transform_2, window_bounds = array<i64: 1, 1>}, {pipeline_mode = #tpu.pipeline_mode<synchronous>, transform_indices = @transform_3, window_bounds = array<i64: 1, 1>}, {transform_indices = @transform_4, window_bounds = array<i64: 1, 4, 256>}]} {
    %c0 = arith.constant 0 : index
    %c0_0 = arith.constant 0 : index
    %c0_1 = arith.constant 0 : index
    %0 = vector.load %arg3[%c0, %c0_0, %c0_1] : memref<1x1x256xf32, #tpu.memory_space<vmem>>, vector<1x1x256xf32>
    %1 = vector.shape_cast %0 : vector<1x1x256xf32> to vector<1x256xf32>
    %c0_2 = arith.constant 0 : index
    %c0_3 = arith.constant 0 : index
    %2 = vector.load %arg4[%c0_2, %c0_3] : memref<1x1xf32, #tpu.memory_space<vmem>>, vector<1x1xf32>
    %3 = vector.broadcast %2 : vector<1x1xf32> to vector<1x256xf32>
    %4 = arith.mulf %1, %3 : vector<1x256xf32>
    %c0_4 = arith.constant 0 : index
    %c0_5 = arith.constant 0 : index
    %5 = vector.load %arg5[%c0_4, %c0_5] : memref<1x1xf32, #tpu.memory_space<vmem>>, vector<1x1xf32>
    %6 = vector.broadcast %5 : vector<1x1xf32> to vector<1x256xf32>
    %7 = arith.addf %4, %6 : vector<1x256xf32>
    %8 = arith.negf %7 : vector<1x256xf32>
    %9 = math.exp %8 : vector<1x256xf32>
    %cst = arith.constant 1.000000e+00 : f32
    %10 = vector.broadcast %cst : f32 to vector<1x256xf32>
    %11 = arith.addf %10, %9 : vector<1x256xf32>
    %12 = arith.divf %10, %11 : vector<1x256xf32>
    %c0_6 = arith.constant 0 : index
    %c0_7 = arith.constant 0 : index
    %c0_8 = arith.constant 0 : index
    %13 = vector.load %arg2[%c0_6, %c0_7, %c0_8] : memref<1x4x256xf32, #tpu.memory_space<vmem>>, vector<1x4x256xf32>
    %14 = vector.shape_cast %13 : vector<1x4x256xf32> to vector<4x256xf32>
    %15 = vector.broadcast %12 : vector<1x256xf32> to vector<4x256xf32>
    %16 = arith.mulf %14, %15 : vector<4x256xf32>
    %c0_9 = arith.constant 0 : index
    %c0_10 = arith.constant 0 : index
    %c0_11 = arith.constant 0 : index
    %17 = vector.load %arg6[%c0_9, %c0_10, %c0_11] : memref<1x4x256xf32, #tpu.memory_space<vmem>>, vector<1x4x256xf32>
    %18 = vector.shape_cast %17 : vector<1x4x256xf32> to vector<4x256xf32>
    %19 = vector.shape_cast %16 : vector<4x256xf32> to vector<1x4x256xf32>
    tpu.vector_store %arg6[%c0_9, %c0_10, %c0_11], %19 {strides = array<i32>} : memref<1x4x256xf32, #tpu.memory_space<vmem>>, vector<1x4x256xf32>,
    return
  }
  func.func @transform_0(%arg0: i32, %arg1: i32) -> (i32, i32, i32) {
    %c0_i32 = arith.constant 0 : i32
    %c0_i32_0 = arith.constant 0 : i32
    return %arg0, %c0_i32, %arg1 : i32, i32, i32
  }
  func.func @transform_1(%arg0: i32, %arg1: i32) -> (i32, i32, i32) {
    %c0_i32 = arith.constant 0 : i32
    %c0_i32_0 = arith.constant 0 : i32
    return %arg0, %c0_i32, %arg1 : i32, i32, i32
  }
  func.func @transform_2(%arg0: i32, %arg1: i32) -> (i32, i32) {
    %c0_i32 = arith.constant 0 : i32
    %c0_i32_0 = arith.constant 0 : i32
    %c0_i32_1 = arith.constant 0 : i32
    return %c0_i32, %c0_i32_0 : i32, i32
  }
  func.func @transform_3(%arg0: i32, %arg1: i32) -> (i32, i32) {
    %c0_i32 = arith.constant 0 : i32
    %c0_i32_0 = arith.constant 0 : i32
    %c0_i32_1 = arith.constant 0 : i32
    return %c0_i32, %c0_i32_0 : i32, i32
  }
  func.func @transform_4(%arg0: i32, %arg1: i32) -> (i32, i32, i32) {
    %c0_i32 = arith.constant 0 : i32
    %c0_i32_0 = arith.constant 0 : i32
    return %arg0, %c0_i32, %arg1 : i32, i32, i32
  }
}

module attributes {stable_mosaic.version = 11 : i64} {
  func.func @_psi_kernel(%arg0: i32, %arg1: i32, %arg2: memref<1x4x256xf32, #tpu.memory_space<vmem>>, %arg3: memref<1x4x256xf32, #tpu.memory_space<vmem>>, %arg4: memref<8x4xf32, #tpu.memory_space<vmem>>, %arg5: memref<8x1xf32, #tpu.memory_space<vmem>>, %arg6: memref<8x4xf32, #tpu.memory_space<vmem>>, %arg7: memref<8x1xf32, #tpu.memory_space<vmem>>, %arg8: memref<8x1xf32, #tpu.memory_space<vmem>>, %arg9: memref<8x1xf32, #tpu.memory_space<vmem>>, %arg10: memref<8x1xf32, #tpu.memory_space<vmem>>, %arg11: memref<8x1xf32, #tpu.memory_space<vmem>>, %arg12: memref<8x1xf32, #tpu.memory_space<vmem>>, %arg13: memref<1x1xf32, #tpu.memory_space<vmem>>, %arg14: memref<1x1x256xf32, #tpu.memory_space<vmem>>, %arg15: memref<1x1xf32, #tpu.memory_space<vmem>>, %arg16: memref<1x1xf32, #tpu.memory_space<vmem>>) attributes {dimension_semantics = [#tpu.dimension_semantics<arbitrary>, #tpu.dimension_semantics<arbitrary>], iteration_bounds = array<i64: 2, 1>, scalar_prefetch = 0 : i64, scratch_operands = 0 : i64, tpu.core_type = #tpu.core_type<tc>, window_params = [{transform_indices = @transform_0, window_bounds = array<i64: 1, 4, 256>}, {transform_indices = @transform_1, window_bounds = array<i64: 1, 4, 256>}, {pipeline_mode = #tpu.pipeline_mode<synchronous>, transform_indices = @transform_2, window_bounds = array<i64: 8, 4>}, {pipeline_mode = #tpu.pipeline_mode<synchronous>, transform_indices = @transform_3, window_bounds = array<i64: 8, 1>}, {pipeline_mode = #tpu.pipeline_mode<synchronous>, transform_indices = @transform_4, window_bounds = array<i64: 8, 4>}, {pipeline_mode = #tpu.pipeline_mode<synchronous>, transform_indices = @transform_5, window_bounds = array<i64: 8, 1>}, {pipeline_mode = #tpu.pipeline_mode<synchronous>, transform_indices = @transform_6, window_bounds = array<i64: 8, 1>}, {pipeline_mode = #tpu.pipeline_mode<synchronous>, transform_indices = @transform_7, window_bounds = array<i64: 8, 1>}, {pipeline_mode = #tpu.pipeline_mode<synchronous>, transform_indices = @transform_8, window_bounds = array<i64: 8, 1>}, {pipeline_mode = #tpu.pipeline_mode<synchronous>, transform_indices = @transform_9, window_bounds = array<i64: 8, 1>}, {pipeline_mode = #tpu.pipeline_mode<synchronous>, transform_indices = @transform_10, window_bounds = array<i64: 8, 1>}, {pipeline_mode = #tpu.pipeline_mode<synchronous>, transform_indices = @transform_11, window_bounds = array<i64: 1, 1>}, {transform_indices = @transform_12, window_bounds = array<i64: 1, 1, 256>}, {pipeline_mode = #tpu.pipeline_mode<synchronous>, transform_indices = @transform_13, window_bounds = array<i64: 1, 1>}, {pipeline_mode = #tpu.pipeline_mode<synchronous>, transform_indices = @transform_14, window_bounds = array<i64: 1, 1>}]} {
    %c0_i32 = arith.constant 0 : i32
    %0 = arith.cmpi eq, %arg0, %c0_i32 : i32
    %c0_i32_0 = arith.constant 0 : i32
    %1 = arith.cmpi eq, %arg1, %c0_i32_0 : i32
    %2 = arith.andi %0, %1 : i1
    %3 = arith.extui %2 : i1 to i32
    %c0_i32_1 = arith.constant 0 : i32
    %4 = arith.cmpi ne, %3, %c0_i32_1 : i32
    scf.if %4 {
      %cst_43 = arith.constant 0.000000e+00 : f32
      %56 = vector.broadcast %cst_43 : f32 to vector<1x1xf32>
      %c0_44 = arith.constant 0 : index
      %c0_45 = arith.constant 0 : index
      %57 = vector.load %arg15[%c0_44, %c0_45] : memref<1x1xf32, #tpu.memory_space<vmem>>, vector<1x1xf32>
      tpu.vector_store %arg15[%c0_44, %c0_45], %56 {strides = array<i32>} : memref<1x1xf32, #tpu.memory_space<vmem>>, vector<1x1xf32>,
      %cst_46 = arith.constant 0.000000e+00 : f32
      %58 = vector.broadcast %cst_46 : f32 to vector<1x1xf32>
      %c0_47 = arith.constant 0 : index
      %c0_48 = arith.constant 0 : index
      %59 = vector.load %arg16[%c0_47, %c0_48] : memref<1x1xf32, #tpu.memory_space<vmem>>, vector<1x1xf32>
      tpu.vector_store %arg16[%c0_47, %c0_48], %58 {strides = array<i32>} : memref<1x1xf32, #tpu.memory_space<vmem>>, vector<1x1xf32>,
    } else {
    }
    %c0 = arith.constant 0 : index
    %c0_2 = arith.constant 0 : index
    %c0_3 = arith.constant 0 : index
    %5 = vector.load %arg2[%c0, %c0_2, %c0_3] : memref<1x4x256xf32, #tpu.memory_space<vmem>>, vector<1x4x256xf32>
    %6 = vector.shape_cast %5 : vector<1x4x256xf32> to vector<4x256xf32>
    %c0_4 = arith.constant 0 : index
    %c0_5 = arith.constant 0 : index
    %c0_6 = arith.constant 0 : index
    %7 = vector.load %arg3[%c0_4, %c0_5, %c0_6] : memref<1x4x256xf32, #tpu.memory_space<vmem>>, vector<1x4x256xf32>
    %8 = vector.shape_cast %7 : vector<1x4x256xf32> to vector<4x256xf32>
    %c0_7 = arith.constant 0 : index
    %c0_8 = arith.constant 0 : index
    %9 = vector.load %arg4[%c0_7, %c0_8] : memref<8x4xf32, #tpu.memory_space<vmem>>, vector<8x4xf32>
    %cst = arith.constant dense<0.000000e+00> : vector<8x256xf32>
    %10 = tpu.matmul %9, %6, %cst {dimension_numbers = #tpu.dot_dimension_numbers<[1], [0], [0], [1], [0, 0, 1, 1], [], []>, precision = #tpu.contract_precision<fp32>} : vector<8x4xf32>, vector<4x256xf32>, vector<8x256xf32> -> vector<8x256xf32>
    %c0_9 = arith.constant 0 : index
    %c0_10 = arith.constant 0 : index
    %11 = vector.load %arg5[%c0_9, %c0_10] : memref<8x1xf32, #tpu.memory_space<vmem>>, vector<8x1xf32>
    %12 = vector.broadcast %11 : vector<8x1xf32> to vector<8x256xf32>
    %13 = arith.addf %10, %12 : vector<8x256xf32>
    %c0_11 = arith.constant 0 : index
    %c0_12 = arith.constant 0 : index
    %14 = vector.load %arg6[%c0_11, %c0_12] : memref<8x4xf32, #tpu.memory_space<vmem>>, vector<8x4xf32>
    %cst_13 = arith.constant dense<0.000000e+00> : vector<8x256xf32>
    %15 = tpu.matmul %14, %8, %cst_13 {dimension_numbers = #tpu.dot_dimension_numbers<[1], [0], [0], [1], [0, 0, 1, 1], [], []>, precision = #tpu.contract_precision<fp32>} : vector<8x4xf32>, vector<4x256xf32>, vector<8x256xf32> -> vector<8x256xf32>
    %c0_14 = arith.constant 0 : index
    %c0_15 = arith.constant 0 : index
    %16 = vector.load %arg7[%c0_14, %c0_15] : memref<8x1xf32, #tpu.memory_space<vmem>>, vector<8x1xf32>
    %17 = vector.broadcast %16 : vector<8x1xf32> to vector<8x256xf32>
    %18 = arith.addf %15, %17 : vector<8x256xf32>
    %c0_16 = arith.constant 0 : index
    %c0_17 = arith.constant 0 : index
    %19 = vector.load %arg8[%c0_16, %c0_17] : memref<8x1xf32, #tpu.memory_space<vmem>>, vector<8x1xf32>
    %20 = vector.broadcast %19 : vector<8x1xf32> to vector<8x256xf32>
    %21 = arith.mulf %13, %20 : vector<8x256xf32>
    %c0_18 = arith.constant 0 : index
    %c0_19 = arith.constant 0 : index
    %22 = vector.load %arg9[%c0_18, %c0_19] : memref<8x1xf32, #tpu.memory_space<vmem>>, vector<8x1xf32>
    %23 = vector.broadcast %22 : vector<8x1xf32> to vector<8x256xf32>
    %24 = arith.addf %21, %23 : vector<8x256xf32>
    %c0_20 = arith.constant 0 : index
    %c0_21 = arith.constant 0 : index
    %25 = vector.load %arg10[%c0_20, %c0_21] : memref<8x1xf32, #tpu.memory_space<vmem>>, vector<8x1xf32>
    %26 = vector.broadcast %25 : vector<8x1xf32> to vector<8x256xf32>
    %27 = arith.mulf %18, %26 : vector<8x256xf32>
    %28 = arith.addf %24, %27 : vector<8x256xf32>
    %c0_22 = arith.constant 0 : index
    %c0_23 = arith.constant 0 : index
    %29 = vector.load %arg11[%c0_22, %c0_23] : memref<8x1xf32, #tpu.memory_space<vmem>>, vector<8x1xf32>
    %30 = vector.broadcast %29 : vector<8x1xf32> to vector<8x256xf32>
    %31 = arith.addf %28, %30 : vector<8x256xf32>
    %cst_24 = arith.constant 0.000000e+00 : f32
    %32 = vector.broadcast %cst_24 : f32 to vector<8x256xf32>
    %33 = arith.maximumf %31, %32 : vector<8x256xf32>
    %c0_25 = arith.constant 0 : index
    %c0_26 = arith.constant 0 : index
    %34 = vector.load %arg12[%c0_25, %c0_26] : memref<8x1xf32, #tpu.memory_space<vmem>>, vector<8x1xf32>
    %35 = vector.broadcast %34 : vector<8x1xf32> to vector<8x256xf32>
    %36 = arith.mulf %33, %35 : vector<8x256xf32>
    %cst_27 = arith.constant dense<0.000000e+00> : vector<256xf32>
    %37 = vector.multi_reduction <add>, %36, %cst_27 [0] : vector<8x256xf32> to vector<256xf32>
    %38 = vector.shape_cast %37 : vector<256xf32> to vector<1x256xf32>
    %c0_28 = arith.constant 0 : index
    %c0_29 = arith.constant 0 : index
    %39 = vector.load %arg13[%c0_28, %c0_29] : memref<1x1xf32, #tpu.memory_space<vmem>>, vector<1x1xf32>
    %40 = vector.broadcast %39 : vector<1x1xf32> to vector<1x256xf32>
    %41 = arith.addf %38, %40 : vector<1x256xf32>
    %c0_30 = arith.constant 0 : index
    %c0_31 = arith.constant 0 : index
    %c0_32 = arith.constant 0 : index
    %42 = vector.load %arg14[%c0_30, %c0_31, %c0_32] : memref<1x1x256xf32, #tpu.memory_space<vmem>>, vector<1x1x256xf32>
    %43 = vector.shape_cast %42 : vector<1x1x256xf32> to vector<1x256xf32>
    %44 = vector.shape_cast %41 : vector<1x256xf32> to vector<1x1x256xf32>
    tpu.vector_store %arg14[%c0_30, %c0_31, %c0_32], %44 {strides = array<i32>} : memref<1x1x256xf32, #tpu.memory_space<vmem>>, vector<1x1x256xf32>,
    %c0_33 = arith.constant 0 : index
    %c0_34 = arith.constant 0 : index
    %45 = vector.load %arg15[%c0_33, %c0_34] : memref<1x1xf32, #tpu.memory_space<vmem>>, vector<1x1xf32>
    %cst_35 = arith.constant dense<0.000000e+00> : vector<1xf32>
    %46 = vector.multi_reduction <add>, %41, %cst_35 [1] : vector<1x256xf32> to vector<1xf32>
    %47 = vector.shape_cast %46 : vector<1xf32> to vector<1x1xf32>
    %48 = arith.addf %45, %47 : vector<1x1xf32>
    %c0_36 = arith.constant 0 : index
    %c0_37 = arith.constant 0 : index
    %49 = vector.load %arg15[%c0_36, %c0_37] : memref<1x1xf32, #tpu.memory_space<vmem>>, vector<1x1xf32>
    tpu.vector_store %arg15[%c0_36, %c0_37], %48 {strides = array<i32>} : memref<1x1xf32, #tpu.memory_space<vmem>>, vector<1x1xf32>,
    %c0_38 = arith.constant 0 : index
    %c0_39 = arith.constant 0 : index
    %50 = vector.load %arg16[%c0_38, %c0_39] : memref<1x1xf32, #tpu.memory_space<vmem>>, vector<1x1xf32>
    %51 = arith.mulf %41, %41 : vector<1x256xf32>
    %cst_40 = arith.constant dense<0.000000e+00> : vector<1xf32>
    %52 = vector.multi_reduction <add>, %51, %cst_40 [1] : vector<1x256xf32> to vector<1xf32>
    %53 = vector.shape_cast %52 : vector<1xf32> to vector<1x1xf32>
    %54 = arith.addf %50, %53 : vector<1x1xf32>
    %c0_41 = arith.constant 0 : index
    %c0_42 = arith.constant 0 : index
    %55 = vector.load %arg16[%c0_41, %c0_42] : memref<1x1xf32, #tpu.memory_space<vmem>>, vector<1x1xf32>
    tpu.vector_store %arg16[%c0_41, %c0_42], %54 {strides = array<i32>} : memref<1x1xf32, #tpu.memory_space<vmem>>, vector<1x1xf32>,
    return
  }
  func.func @transform_0(%arg0: i32, %arg1: i32) -> (i32, i32, i32) {
    %c0_i32 = arith.constant 0 : i32
    %c0_i32_0 = arith.constant 0 : i32
    return %arg0, %c0_i32, %arg1 : i32, i32, i32
  }
  func.func @transform_1(%arg0: i32, %arg1: i32) -> (i32, i32, i32) {
    %c0_i32 = arith.constant 0 : i32
    %c0_i32_0 = arith.constant 0 : i32
    return %arg0, %c0_i32, %arg1 : i32, i32, i32
  }
  func.func @transform_2(%arg0: i32, %arg1: i32) -> (i32, i32) {
    %c0_i32 = arith.constant 0 : i32
    %c0_i32_0 = arith.constant 0 : i32
    %c0_i32_1 = arith.constant 0 : i32
    return %c0_i32, %c0_i32_0 : i32, i32
  }
  func.func @transform_3(%arg0: i32, %arg1: i32) -> (i32, i32) {
    %c0_i32 = arith.constant 0 : i32
    %c0_i32_0 = arith.constant 0 : i32
    %c0_i32_1 = arith.constant 0 : i32
    return %c0_i32, %c0_i32_0 : i32, i32
  }
  func.func @transform_4(%arg0: i32, %arg1: i32) -> (i32, i32) {
    %c0_i32 = arith.constant 0 : i32
    %c0_i32_0 = arith.constant 0 : i32
    %c0_i32_1 = arith.constant 0 : i32
    return %c0_i32, %c0_i32_0 : i32, i32
  }
  func.func @transform_5(%arg0: i32, %arg1: i32) -> (i32, i32) {
    %c0_i32 = arith.constant 0 : i32
    %c0_i32_0 = arith.constant 0 : i32
    %c0_i32_1 = arith.constant 0 : i32
    return %c0_i32, %c0_i32_0 : i32, i32
  }
  func.func @transform_6(%arg0: i32, %arg1: i32) -> (i32, i32) {
    %c0_i32 = arith.constant 0 : i32
    %c0_i32_0 = arith.constant 0 : i32
    %c0_i32_1 = arith.constant 0 : i32
    return %c0_i32, %c0_i32_0 : i32, i32
  }
  func.func @transform_7(%arg0: i32, %arg1: i32) -> (i32, i32) {
    %c0_i32 = arith.constant 0 : i32
    %c0_i32_0 = arith.constant 0 : i32
    %c0_i32_1 = arith.constant 0 : i32
    return %c0_i32, %c0_i32_0 : i32, i32
  }
  func.func @transform_8(%arg0: i32, %arg1: i32) -> (i32, i32) {
    %c0_i32 = arith.constant 0 : i32
    %c0_i32_0 = arith.constant 0 : i32
    %c0_i32_1 = arith.constant 0 : i32
    return %c0_i32, %c0_i32_0 : i32, i32
  }
  func.func @transform_9(%arg0: i32, %arg1: i32) -> (i32, i32) {
    %c0_i32 = arith.constant 0 : i32
    %c0_i32_0 = arith.constant 0 : i32
    %c0_i32_1 = arith.constant 0 : i32
    return %c0_i32, %c0_i32_0 : i32, i32
  }
  func.func @transform_10(%arg0: i32, %arg1: i32) -> (i32, i32) {
    %c0_i32 = arith.constant 0 : i32
    %c0_i32_0 = arith.constant 0 : i32
    %c0_i32_1 = arith.constant 0 : i32
    return %c0_i32, %c0_i32_0 : i32, i32
  }
  func.func @transform_11(%arg0: i32, %arg1: i32) -> (i32, i32) {
    %c0_i32 = arith.constant 0 : i32
    %c0_i32_0 = arith.constant 0 : i32
    %c0_i32_1 = arith.constant 0 : i32
    return %c0_i32, %c0_i32_0 : i32, i32
  }
  func.func @transform_12(%arg0: i32, %arg1: i32) -> (i32, i32, i32) {
    %c0_i32 = arith.constant 0 : i32
    %c0_i32_0 = arith.constant 0 : i32
    return %arg0, %c0_i32, %arg1 : i32, i32, i32
  }
  func.func @transform_13(%arg0: i32, %arg1: i32) -> (i32, i32) {
    %c0_i32 = arith.constant 0 : i32
    %c0_i32_0 = arith.constant 0 : i32
    %c0_i32_1 = arith.constant 0 : i32
    return %c0_i32, %c0_i32_0 : i32, i32
  }
  func.func @transform_14(%arg0: i32, %arg1: i32) -> (i32, i32) {
    %c0_i32 = arith.constant 0 : i32
    %c0_i32_0 = arith.constant 0 : i32
    %c0_i32_1 = arith.constant 0 : i32
    return %c0_i32, %c0_i32_0 : i32, i32
  }
}

</mosaic_0001>

<bundles_post_ra>
// kernel: attention_block.5
= control target key start
LH: loop header
LB: loop body
LE: loop exit
PB: predicated region body
PF: predicated region fallthrough
CT: control target
= control target key end

     0   :  { %s520_s19 = smov 0   ;;  %s522_s20 = smov 0   ;;  %s556_s0 = inlined_call_operand.vmem [shape: f32[2,4,256], index: 0, kind: input, shape index: {}]   ;;  %s557_s1 = inlined_call_operand.vmem [shape: f32[2,1,256], index: 1, kind: input, shape index: {}]   ;;  %s558_s2 = inlined_call_operand.<no memory space> [shape: f32[1,1], index: 2, kind: input, shape index: {}]   ;;  %s559_s4 = inlined_call_operand.vmem [shape: f32[2,4,256], index: 4, kind: output, shape index: {}]   ;;  %s560_s3 = inlined_call_operand.<no memory space> [shape: f32[1,1], index: 3, kind: input, shape index: {}]  }
   0x1   :  { %v9_v0 = vstv %s558_s2  ;;  %v11_v1 = vstv %s560_s3  ;;  %s524_s21 = smov 0  }
   0x2   :  { %10 = vst [vmem:[#allocation2] sm:$0x1] %v9_v0  ;;  %12 = vst [vmem:[#allocation3] sm:$0x1] %v11_v1 }
   0x3 LB: > { %s30_s2 = sadd.s32 1, %s482_s20  ;;  %p423_p0 = scmp.ge.s32.totalorder %s486_s21, 1  ;;  %s486_s21 = sphi %s524_s21, %s18_s21   ;;  %s482_s20 = sphi %s522_s20, %s562_s20   ;;  %s478_s19 = sphi %s520_s19, %s561_s19  }
   0x4   : > { %p32_p1 = scmp.ge.s32.totalorder %s30_s2, 2  ;;  %p203_p2 = scmp.lt.s32.totalorder %s486_s21, 3 }
   0x6   : > { %s564_s2 = smov (%p32_p1, %s30_s2), 0  ;;  %p204_p3 = pnand %p423_p0, %p203_p2 }
   0x7   : > { %v488_v3 = vmov (!%p204_p3), 0   ;;  %p246_p4 = scmp.lt.s32.totalorder (!%p204_p3), %s478_s19, 1  ;;  %v281_v5 = vlaneseq (!%p204_p3) }
   0x8   : > { %207 = sbr.rel (%p204_p3) target bundleno = 179 (0xb3), region = 36  ;;  %459 = vset.pattern.permute.xlu0 (!%p204_p3), %v488_v3 }
   0x9   : > { %v275_v2 = vld [vmem:[#allocation2] sm:$0x1] (!%p204_p3)  ;;  %v286_v4 = vld [vmem:[#allocation3] sm:$0x1] (!%p204_p3)  ;;  %v282_v6 = vshrl.u32 (!%p204_p3), %v281_v5, 7 }
   0xa   : > { %278 = vperm.xlu0 (!%p204_p3), %459, %v275_v2  }
   0xb   : > { %v283_v7 = vsub.s32 (!%p204_p3), 0, %v282_v6  ;;  %v311_v18 = vsub.s32 (!%p204_p3), 1, %v282_v6 }
   0xe   : > { %289 = vperm.xlu0 (!%p204_p3), %459, %v286_v4  }
   0xf   : > { %s566_s19 = smov (!%p246_p4, %s478_s19), 1 }
  0x10   : > { %s426_s3 = sshll.u32 %s566_s19, 1  ;;  %s432_s25 = sshll.u32 %s566_s19, 3 }
  0x11   : > { %s262_s24 = scalar_lea.vmem %s557_s1, %s426_s3  ;;  %s253_s28 = scalar_lea.vmem %s556_s0, %s432_s25 }
  0x12   : > { %v274_v10 = vld [vmem:[%s262_s24] sm:$0x3]  ;;  %s272_s5 = scalar_lea.vmem %s559_s4, %s432_s25 }
  0x13   : > { %v303_v22 = vld [vmem:[%s253_s28] sm:$0xff] }
  0x89   : > { %v279_v8 = vpop.permute.xlu0 %278 }
  0x8a   : > { %v284_v9 = vrot.slane %v279_v8, %v283_v7 }
  0x8c   : > { %v285_v12 = vmul.f32 %v284_v9, %v274_v10 }
  0x8d   : > { %v290_v11 = vpop.permute.xlu0 %289 }
  0x8e   : > { %v295_v13 = vrot.slane %v290_v11, %v283_v7 }
  0x90   : > { %v296_v14 = vadd.f32 %v295_v13, %v285_v12 }
  0x92   : > { %v429_v15 = vmul.f32 -1.442695, %v296_v14 }
  0x94   : > { %460 = vpow2.f32 %v429_v15 }
  0x9e   : > { %v461_v16 = vpop.eup %460 }
  0x9f   : > { %v300_v17 = vadd.f32 1.0, %v461_v16 }
  0xa1   : > { %462 = vrcp.f32 %v300_v17 }
  0xab   : > { %v463_v19 = vpop.eup %462 }
  0xac   : > { %v308_v20 = vrot.slane %v463_v19, %v283_v7  ;;  %v312_v21 = vrot.slane %v463_v19, %v311_v18 }
  0xae   : > { %v313_v23 = vcombine.low %v308_v20, %v312_v21 }
  0xb0   : > { %v315_v24 = vmul.f32 %v313_v23, %v303_v22 }
  0xb2   : > { %316 = vst [vmem:[%s272_s5] sm:$0xff] %v315_v24 }
  0xb3 PF: > { %s18_s21 = sadd.s32 1, %s486_s21   ;;  %s561_s19 = smov %s482_s20 }
  0xb4   : > { %p15_p5 = scmp.ge.s32.totalorder %s18_s21, 4   ;;  %s562_s20 = smov %s564_s2 }
  0xb6   :  { %17 = sbr.rel (!%p15_p5) target bundleno = 3 (0x3), region = 69 }

// kernel: attention_block.3
= control target key start
LH: loop header
LB: loop body
LE: loop exit
PB: predicated region body
PF: predicated region fallthrough
CT: control target
= control target key end

     0   :  { %s1603_s30 = smov 0   ;;  %s1605_s10 = smov 0   ;;  %s1741_s0 = inlined_call_operand.vmem [shape: f32[2,4,256], index: 0, kind: input, shape index: {}]   ;;  %s1742_s1 = inlined_call_operand.vmem [shape: f32[2,4,256], index: 1, kind: input, shape index: {}]   ;;  %s1743_s2 = inlined_call_operand.vmem [shape: f32[8,4], index: 2, kind: input, shape index: {}]   ;;  %s1744_s3 = inlined_call_operand.vmem [shape: f32[8,1], index: 3, kind: input, shape index: {}]   ;;  %s1745_s4 = inlined_call_operand.vmem [shape: f32[8,4], index: 4, kind: input, shape index: {}]   ;;  %s1746_s5 = inlined_call_operand.vmem [shape: f32[8,1], index: 5, kind: input, shape index: {}]   ;;  %s1747_s6 = inlined_call_operand.vmem [shape: f32[8,1], index: 6, kind: output, shape index: {0}]   ;;  %s1748_s7 = inlined_call_operand.vmem [shape: f32[8,1], index: 7, kind: output, shape index: {1}]   ;;  %s1749_s8 = inlined_call_operand.vmem [shape: f32[8,1], index: 8, kind: output, shape index: {2}]   ;;  %s1750_s9 = inlined_call_operand.vmem [shape: f32[8,1], index: 9, kind: output, shape index: {3}]  }
   0x1   :  { %s1607_s11 = smov 0  }
   0x2 LB: > { %s32_s12 = sadd.s32 1, %s1544_s10  ;;  %p1461_p0 = scmp.ge.s32.totalorder %s1548_s11, 1  ;;  %s1548_s11 = sphi %s1607_s11, %s20_s11   ;;  %s1544_s10 = sphi %s1605_s10, %s1752_s10   ;;  %s1540_s30 = sphi %s1603_s30, %s1751_s30  }
   0x3   : > { %p34_p1 = scmp.ge.s32.totalorder %s32_s12, 2  ;;  %p310_p2 = scmp.lt.s32.totalorder %s1548_s11, 3 }
   0x5   : > { %s1754_s12 = smov (%p34_p1, %s32_s12), 0  ;;  %p311_p3 = pnand %p1461_p0, %p310_p2 }
   0x6   : > { %p355_p4 = scmp.lt.s32.totalorder (!%p311_p3), %s1540_s30, 1  ;;  %p374_p5 = scmp.eq.s32.totalorder (!%p311_p3), %s1540_s30, 0 }
   0x7   : > { %314 = sbr.rel (%p311_p3) target bundleno = 445 (0x1bd), region = 44 }
   0xe   : > { %s1756_s30 = smov (!%p355_p4, %s1540_s30), 1  ;;  %379 = sbr.rel (!%p374_p5) target bundleno = 21 (0x15), region = 48 }
   0xf   : > { %s1469_s13 = sshll.u32 %s1756_s30, 3  ;;  %vm380_vm0 = vcmask (%p374_p5), 7168   ;;  %v1550_v0 = vmov (%p374_p5), 0.0  }
  0x10   : > { %s362_s16 = scalar_lea.vmem %s1741_s0, %s1469_s13  ;;  %s372_s19 = scalar_lea.vmem %s1742_s1, %s1469_s13  ;;  %381 = vst.msk [vmem:[%s1747_s6] sm:$0xff] (%p374_p5), %vm380_vm0, %v1550_v0  ;;  %382 = vst.msk [vmem:[%s1748_s7] sm:$0xff] (%p374_p5), %vm380_vm0, %v1550_v0 }
  0x11   : > { %383 = vst.msk [vmem:[%s1749_s8] sm:$0xff] (%p374_p5), %vm380_vm0, %v1550_v0  ;;  %384 = vst.msk [vmem:[%s1750_s9] sm:$0xff] (%p374_p5), %vm380_vm0, %v1550_v0 }
  0x15 PF: > { %v385_v1 = vld [vmem:[%s362_s16] sm:$0xff]  ;;  %vm400_vm1 = vcmask 1043456   ;;  %vm396_vm2 = vcmask 31744   ;;  %v1551_v7 = vmov 0.0   ;;  %v1552_v35 = vmov 0  }
  0x16   : > { %v386_v2 = vld [vmem:[%s372_s19] sm:$0xff]  ;;  %v395_v4 = vcombine.high %v385_v1, %v385_v1  ;;  %v401_v6 = vsel %vm400_vm1, %v385_v1, 0  ;;  %471 = vmatprep.mubr.f32.mxu0 %v1551_v7  ;;  %952 = vmatprep.mubr.f32.mxu1 %v1551_v7  ;;  %vm1356_vm3 = vcmask 7168  }
  0x17   : > { %v387_v3 = vld [vmem:[%s1743_s2] sm:$0xff]  ;;  %v878_v5 = vcombine.high %v386_v2, %v386_v2  ;;  %v882_v8 = vsel %vm400_vm1, %v386_v2, 0  ;;  %v1649_v10 = vand.u32 4294901760, %v401_v6  ;;  %1523 = vset.pattern.permute.xlu0 %v1552_v35 }
  0x18   : > { %v870_v9 = vld [vmem:[%s1745_s4] sm:$0xff]  ;;  %v1651_v11 = vand.u32 4294901760, %v882_v8  ;;  %v398_v12 = vsel %vm396_vm2, %v387_v3, 0  ;;  %v403_v14 = vsel %vm400_vm1, %v395_v4, 0 }
  0x19   : > { %v880_v13 = vsel %vm396_vm2, %v870_v9, 0  ;;  %v884_v15 = vsel %vm400_vm1, %v878_v5, 0  ;;  %v1655_v16 = vand.u32 4294901760, %v398_v12  ;;  %v1659_v18 = vand.u32 4294901760, %v403_v14  ;;  %v388_v28 = vld [vmem:[%s1744_s3] sm:$0xff] }
  0x1a   : > { %v1657_v17 = vand.u32 4294901760, %v880_v13  ;;  %v1661_v19 = vand.u32 4294901760, %v884_v15  ;;  %v490_v20 = vsub.f32 %v401_v6, %v1649_v10  ;;  %v1665_v21 = vsub.f32 %v882_v8, %v1651_v11  ;;  %391 = vperm.xlu0 %1523, %v388_v28   ;;  %v871_v46 = vld [vmem:[%s1746_s5] sm:$0xff] }
  0x1b   : > { %v473_v22 = vsub.f32 %v398_v12, %v1655_v16  ;;  %406 = vmatprep.subr.mxu0 %v1659_v18  ;;  %v484_v24 = vsub.f32 %v403_v14, %v1659_v18  ;;  %v1366_v1 = vld [vmem:[%s1749_s8] sm:$0xff] }
  0x1c   : > { %v954_v23 = vsub.f32 %v880_v13, %v1657_v17  ;;  %887 = vmatprep.subr.mxu1 %v1661_v19  ;;  %v491_v25 = vand.u32 4294901760, %v490_v20  ;;  %v965_v26 = vsub.f32 %v884_v15, %v1661_v19  ;;  %v972_v27 = vand.u32 4294901760, %v1665_v21  ;;  %408 = vmatpush1.msra.mxu0 %v1649_v10  ;;  %v1351_v2 = vld [vmem:[%s1747_s6] sm:$0xff] }
  0x1d   : > { %889 = vmatpush1.msra.mxu1 %v1651_v11  ;;  %v474_v29 = vand.u32 4294901760, %v473_v22  ;;  %v485_v31 = vand.u32 4294901760, %v484_v24 }
  0x1e   : > { %v955_v30 = vand.u32 4294901760, %v954_v23  ;;  %v492_v32 = vsub.f32 %v490_v20, %v491_v25  ;;  %v966_v33 = vand.u32 4294901760, %v965_v26  ;;  %v973_v34 = vsub.f32 %v1665_v21, %v972_v27  ;;  %874 = vperm.xlu0 %1523, %v871_v46  }
  0x1f   : > { %v475_v36 = vsub.f32 %v473_v22, %v474_v29  ;;  %v486_v38 = vsub.f32 %v484_v24, %v485_v31 }
  0x20   : > { %v956_v37 = vsub.f32 %v954_v23, %v955_v30  ;;  %v967_v39 = vsub.f32 %v965_v26, %v966_v33  ;;  %v493_v42 = vand.u32 4294901760, %v492_v32  ;;  %v974_v45 = vand.u32 4294901760, %v973_v34 }
  0x21   : > { %v476_v40 = vand.u32 4294901760, %v475_v36  ;;  %v487_v43 = vand.u32 4294901760, %v486_v38 }
  0x22   : > { %v957_v41 = vand.u32 4294901760, %v956_v37  ;;  %v968_v44 = vand.u32 4294901760, %v967_v39 }
  0x23   : > { %477 = vmatmul.mubr.f32.vlgmr.msra.gmra.mrb[0].mxu0 %v476_v40  ;;  %488 = vmatprep.subr.mxu0 %v487_v43 }
  0x24   : > { %958 = vmatmul.mubr.f32.vlgmr.msra.gmra.mrb[0].mxu1 %v957_v41  ;;  %969 = vmatprep.subr.mxu1 %v968_v44 }
  0x25   : > { %494 = vmatpush1.msra.mxu0 %v493_v42  ;;  %557 = vmatprep.mubr.f32.mxu0 %v1551_v7 }
  0x26   : > { %975 = vmatpush1.msra.mxu1 %v974_v45  ;;  %1038 = vmatprep.mubr.f32.mxu1 %v1551_v7 }
  0x27   : > { %567 = vmatprep.subr.mxu0 %v484_v24  ;;  %1048 = vmatprep.subr.mxu1 %v965_v26 }
  0x2b   : > { %559 = vmatmul.mubr.f32.vlgmr.msra.gmra.mrb[0].mxu0 %v1655_v16 }
  0x2c   : > { %1040 = vmatmul.mubr.f32.vlgmr.msra.gmra.mrb[0].mxu1 %v1657_v17  ;;  %570 = vmatpush1.msra.mxu0 %v490_v20 }
  0x2d   : > { %633 = vmatprep.mubr.f32.mxu0 %v1551_v7  ;;  %1051 = vmatpush1.msra.mxu1 %v1665_v21 }
  0x2e   : > { %1114 = vmatprep.mubr.f32.mxu1 %v1551_v7  ;;  %643 = vmatprep.subr.mxu0 %v1659_v18 }
  0x2f   : > { %1124 = vmatprep.subr.mxu1 %v1661_v19 }
  0x33   : > { %636 = vmatmul.mubr.f32.vlgmr.msra.gmra.mrb[0].mxu0 %v473_v22 }
  0x34   : > { %1117 = vmatmul.mubr.f32.vlgmr.msra.gmra.mrb[0].mxu1 %v954_v23  ;;  %645 = vmatpush1.msra.mxu0 %v1649_v10 }
  0x35   : > { %708 = vmatprep.mubr.f32.mxu0 %v1551_v7  ;;  %1126 = vmatpush1.msra.mxu1 %v1651_v11 }
  0x36   : > { %1189 = vmatprep.mubr.f32.mxu1 %v1551_v7  ;;  %721 = vmatprep.subr.mxu0 %v485_v31 }
  0x37   : > { %1202 = vmatprep.subr.mxu1 %v966_v33 }
  0x3b   : > { %712 = vmatmul.mubr.f32.vlgmr.msra.gmra.mrb[0].mxu0 %v474_v29 }
  0x3c   : > { %1193 = vmatmul.mubr.f32.vlgmr.msra.gmra.mrb[0].mxu1 %v955_v30  ;;  %725 = vmatpush1.msra.mxu0 %v491_v25 }
  0x3d   : > { %788 = vmatprep.mubr.f32.mxu0 %v1551_v7  ;;  %1206 = vmatpush1.msra.mxu1 %v972_v27 }
  0x3e   : > { %1269 = vmatprep.mubr.f32.mxu1 %v1551_v7  ;;  %797 = vmatprep.subr.mxu0 %v1659_v18 }
  0x3f   : > { %1278 = vmatprep.subr.mxu1 %v1661_v19 }
  0x43   : > { %790 = vmatmul.mubr.f32.vlgmr.msra.gmra.mrb[0].mxu0 %v1655_v16 }
  0x44   : > { %1271 = vmatmul.mubr.f32.vlgmr.msra.gmra.mrb[0].mxu1 %v1657_v17  ;;  %799 = vmatpush1.msra.mxu0 %v1649_v10  ;;  %v1372_v10 = vld [vmem:[%s1750_s9] sm:$0xff] }
  0x45   : > { %862 = vmatprep.mubr.f32.mxu0 %v1551_v7  ;;  %1280 = vmatpush1.msra.mxu1 %v1651_v11 }
  0x46   : > { %1343 = vmatprep.mubr.f32.mxu1 %v1551_v7  ;;  %v1358_v7 = vld [vmem:[%s1748_s7] sm:$0xff] }
  0x4b   : > { %864 = vmatmul.mubr.f32.vlgmr.msra.gmra.mrb[0].mxu0 %v1655_v16 }
  0x4c   : > { %1345 = vmatmul.mubr.f32.vlgmr.msra.gmra.mrb[0].mxu1 %v1657_v17 }
  0x99   : > { %v392_v47 = vpop.permute.xlu0 %391 }
  0x9d   : > { %v875_v48 = vpop.permute.xlu0 %874 }
 0x11e   : > { %v865_v49 = vpop.f32.mrb[0].mxu0 }
 0x11f   : > { %v1346_v50 = vpop.f32.mrb[0].mxu1  ;;  %v1472_v51 = vadd.f32 %v865_v49, %v392_v47  ;;  %v867_v53 = vpop.f32.mrb[1].mxu0 }
 0x120   : > { %v1474_v52 = vadd.f32 %v1346_v50, %v875_v48  ;;  %v1348_v54 = vpop.f32.mrb[1].mxu1  ;;  %v1473_v55 = vadd.f32 %v867_v53, %v392_v47 }
 0x121   : > { %v1475_v56 = vadd.f32 %v1348_v54, %v875_v48  ;;  %v1359_v57 = vmul.f32 %v1472_v51, %v1472_v51 }
 0x122   : > { %v1373_v58 = vmul.f32 %v1474_v52, %v1474_v52  ;;  %v1360_v59 = vmul.f32 %v1473_v55, %v1473_v55  ;;  %v1352_v62 = vadd.f32 %v1473_v55, %v1472_v51 }
 0x123   : > { %v1374_v60 = vmul.f32 %v1475_v56, %v1475_v56  ;;  %v1367_v61 = vadd.f32 %v1475_v56, %v1474_v52 }
 0x124   : > { %1353 = vadd.xlane.f32.xlu1 %v1352_v62  ;;  %v1361_v63 = vadd.f32 %v1360_v59, %v1359_v57 }
 0x125   : > { %1368 = vadd.xlane.f32.xlu0 %v1367_v61  ;;  %v1375_v0 = vadd.f32 %v1374_v60, %v1373_v58 }
 0x128   : > { %1362 = vadd.xlane.f32.xlu1 %v1361_v63 }
 0x12c   : > { %1376 = vadd.xlane.f32.xlu1 %v1375_v0 }
 0x1b1   : > { %v1354_v4 = vpop.xlane.xlu1 %1353 }
 0x1b2   : > { %v1369_v3 = vpop.xlane.xlu0 %1368  ;;  %v1355_v6 = vadd.f32 %v1354_v4, %v1351_v2 }
 0x1b3   : > { %v1370_v5 = vadd.f32 %v1369_v3, %v1366_v1 }
 0x1b4   : > { %1357 = vst.msk [vmem:[%s1747_s6] sm:$0xff] %vm1356_vm3, %v1355_v6 }
 0x1b5   : > { %1371 = vst.msk [vmem:[%s1749_s8] sm:$0xff] %vm1356_vm3, %v1370_v5  ;;  %v1363_v8 = vpop.xlane.xlu1 %1362 }
 0x1b6   : > { %v1364_v9 = vadd.f32 %v1363_v8, %v1358_v7 }
 0x1b8   : > { %1365 = vst.msk [vmem:[%s1748_s7] sm:$0xff] %vm1356_vm3, %v1364_v9 }
 0x1b9   : > { %v1377_v11 = vpop.xlane.xlu1 %1376 }
 0x1ba   : > { %v1378_v12 = vadd.f32 %v1377_v11, %v1372_v10 }
 0x1bc   : > { %1379 = vst.msk [vmem:[%s1750_s9] sm:$0xff] %vm1356_vm3, %v1378_v12 }
 0x1bd PF: > { %s20_s11 = sadd.s32 1, %s1548_s11   ;;  %s1751_s30 = smov %s1544_s10 }
 0x1be   : > { %p17_p6 = scmp.ge.s32.totalorder %s20_s11, 4   ;;  %s1752_s10 = smov %s1754_s12 }
 0x1c0   :  { %19 = sbr.rel (!%p17_p6) target bundleno = 2 (0x2), region = 101 }

// kernel: attention_block.4
= control target key start
LH: loop header
LB: loop body
LE: loop exit
PB: predicated region body
PF: predicated region fallthrough
CT: control target
= control target key end

     0   :  { %s2236_s0 = inlined_call_operand.vmem [shape: f32[2,4,256], index: 0, kind: input, shape index: {}]   ;;  %s2237_s1 = inlined_call_operand.vmem [shape: f32[2,4,256], index: 1, kind: input, shape index: {}]   ;;  %s2238_s2 = inlined_call_operand.vmem [shape: f32[8,4], index: 2, kind: input, shape index: {}]   ;;  %s2239_s3 = inlined_call_operand.vmem [shape: f32[8,1], index: 3, kind: input, shape index: {}]   ;;  %s2240_s4 = inlined_call_operand.vmem [shape: f32[8,4], index: 4, kind: input, shape index: {}]   ;;  %s2241_s5 = inlined_call_operand.vmem [shape: f32[8,1], index: 5, kind: input, shape index: {}]   ;;  %s2242_s6 = inlined_call_operand.vmem [shape: f32[8,1], index: 6, kind: input, shape index: {}]   ;;  %s2243_s7 = inlined_call_operand.vmem [shape: f32[8,1], index: 7, kind: input, shape index: {}]   ;;  %s2244_s8 = inlined_call_operand.vmem [shape: f32[8,1], index: 8, kind: input, shape index: {}]   ;;  %s2245_s9 = inlined_call_operand.vmem [shape: f32[8,1], index: 9, kind: input, shape index: {}]   ;;  %s2246_s10 = inlined_call_operand.vmem [shape: f32[8,1], index: 10, kind: input, shape index: {}]   ;;  %s2247_s11 = inlined_call_operand.<no memory space> [shape: f32[1,1], index: 11, kind: input, shape index: {}]   ;;  %s2248_s12 = inlined_call_operand.vmem [shape: f32[2,1,256], index: 12, kind: output, shape index: {0}]   ;;  %s2249_s13 = inlined_call_operand.hbm [shape: f32[1,1], index: 13, kind: output, shape index: {1}]   ;;  %s2250_s14 = inlined_call_operand.hbm [shape: f32[1,1], index: 14, kind: output, shape index: {2}]  }
   0x1   :  { %v20_v0 = vstv %s2247_s11 }
   0x2   :  { %21 = vst [vmem:[#allocation2] sm:$0x1] %v20_v0 }
   0x3   :  { %22 = vsyncpa [#allocation4], 0 }
   0x4   :  { %23 = vsyncpa [#allocation6], 0  ;;  %s2024_s15 = smov 0   ;;  %s2026_s16 = smov 0  }
   0x5   :  { %s2028_s17 = smov 0  }
   0x6 LB: > { %s1766_s11 = sadd.s32 4294967295, %s1938_s17   ;;  %s41_s18 = sadd.s32 1, %s1934_s16  ;;  %s1938_s17 = sphi %s2028_s17, %s29_s17   ;;  %s1934_s16 = sphi %s2026_s16, %s2253_s16   ;;  %s1930_s15 = sphi %s2024_s15, %s2252_s15  }
   0x7   : > { %p43_p0 = scmp.ge.s32.totalorder %s41_s18, 2  ;;  %p1770_p1 = scmp.ge.s32.totalorder %s1938_s17, 1 }
   0x8   : > { %p449_p2 = scmp.lt.s32.totalorder %s1938_s17, 3 }
   0x9   : > { %s2255_s18 = smov (%p43_p0, %s41_s18), 0 }
   0xa   : > { %p450_p3 = pnand %p1770_p1, %p449_p2 }
   0xb   : > { %p512_p4 = scmp.lt.s32.totalorder (!%p450_p3), %s1930_s15, 1  ;;  %p540_p5 = scmp.eq.s32.totalorder (!%p450_p3), %s1930_s15, 0 }
   0xc   : > { %453 = sbr.rel (%p450_p3) target bundleno = 505 (0x1f9), region = 68 }
  0x13   : > { %s2257_s15 = smov (!%p512_p4, %s1930_s15), 1  ;;  %545 = sbr.rel (!%p540_p5) target bundleno = 26 (0x1a), region = 72 }
  0x14   : > { %s1783_s19 = sshll.u32 %s2257_s15, 3  ;;  %s1775_s20 = sshll.u32 %s2257_s15, 1  ;;  %vm546_vm0 = vcmask (%p540_p5), 0   ;;  %v1940_v1 = vmov (%p540_p5), 0.0  }
  0x15   : > { %s519_s23 = scalar_lea.vmem %s2236_s0, %s1783_s19  ;;  %s529_s26 = scalar_lea.vmem %s2237_s1, %s1783_s19  ;;  %547 = vst.msk [vmem:[#allocation3] sm:$0x1] (%p540_p5), %vm546_vm0, %v1940_v1  ;;  %548 = vst.msk [vmem:[#allocation5] sm:$0x1] (%p540_p5), %vm546_vm0, %v1940_v1 }
  0x16   : > { %s2052_s29 = scalar_lea.vmem %s2248_s12, %s1775_s20 }
  0x1a PF: > { %v549_v2 = vld [vmem:[%s519_s23] sm:$0xff]  ;;  %vm564_vm1 = vcmask 1043456   ;;  %vm560_vm2 = vcmask 31744   ;;  %v1941_v8 = vmov 0.0   ;;  %v1942_v37 = vmov 0   ;;  %s1944_s23 = smov [#allocation3]  }
  0x1b   : > { %v550_v3 = vld [vmem:[%s529_s26] sm:$0xff]  ;;  %v559_v5 = vcombine.high %v549_v2, %v549_v2  ;;  %v565_v7 = vsel %vm564_vm1, %v549_v2, 0  ;;  %635 = vmatprep.mubr.f32.mxu0 %v1941_v8  ;;  %1116 = vmatprep.mubr.f32.mxu1 %v1941_v8  ;;  %s1640_s24 = sshll.u32 %s1944_s23, 4  ;;  %vm1611_vm4 = vcmask 0   ;;  %p2169_p6 = scmp.eq.s32.totalorder %s1766_s11, 1  ;;  %s1641_s24 = int_to_ptr.vmem [resolvable:$true] %s1640_s24 }
  0x1c   : > { %v551_v4 = vld [vmem:[%s2238_s2] sm:$0xff]  ;;  %v1042_v6 = vcombine.high %v550_v3, %v550_v3  ;;  %v1046_v9 = vsel %vm564_vm1, %v550_v3, 0  ;;  %v2064_v11 = vand.u32 4294901760, %v565_v7  ;;  %1852 = vset.pattern.permute.xlu0 %v1942_v37  ;;  %1853 = vset.pattern.permute.xlu1 %v1942_v37  ;;  %s1945_s26 = smov [#allocation5]   ;;  %s1862_s11 = scalar_lea.vmem %s1641_s24, 32 }
  0x1d   : > { %v1034_v10 = vld [vmem:[%s2240_s4] sm:$0xff]  ;;  %v2066_v12 = vand.u32 4294901760, %v1046_v9  ;;  %v562_v13 = vsel %vm560_vm2, %v551_v4, 0  ;;  %v567_v15 = vsel %vm564_vm1, %v559_v5, 0  ;;  %s1651_s27 = sshll.u32 %s1945_s26, 4  ;;  %p1863_p10 = scmp.lt.s32.totalorder %s1641_s24, %s1641_s24  ;;  %s2174_s27 = int_to_ptr.vmem [resolvable:$true] %s1651_s27 }
  0x1e   : > { %v1044_v14 = vsel %vm560_vm2, %v1034_v10, 0  ;;  %v1048_v16 = vsel %vm564_vm1, %v1042_v6, 0  ;;  %v2070_v17 = vand.u32 4294901760, %v562_v13  ;;  %v2074_v19 = vand.u32 4294901760, %v567_v15  ;;  %v552_v29 = vld [vmem:[%s2239_s3] sm:$0xff] }
  0x1f   : > { %v2072_v18 = vand.u32 4294901760, %v1044_v14  ;;  %v2076_v20 = vand.u32 4294901760, %v1048_v16  ;;  %v2079_v21 = vsub.f32 %v565_v7, %v2064_v11  ;;  %v2082_v22 = vsub.f32 %v1046_v9, %v2066_v12  ;;  %v1515_v30 = vld [vmem:[%s2242_s6] sm:$0xff]  ;;  %555 = vperm.xlu0 %1852, %v552_v29  }
  0x20   : > { %v2085_v23 = vsub.f32 %v562_v13, %v2070_v17  ;;  %570 = vmatprep.subr.mxu0 %v2074_v19  ;;  %v2093_v25 = vsub.f32 %v567_v15, %v2074_v19  ;;  %1518 = vperm.xlu1 %1853, %v1515_v30   ;;  %v1035_v48 = vld [vmem:[%s2241_s5] sm:$0xff] }
  0x21   : > { %v2088_v24 = vsub.f32 %v1044_v14, %v2072_v18  ;;  %1051 = vmatprep.subr.mxu1 %v2076_v20  ;;  %v655_v26 = vand.u32 4294901760, %v2079_v21  ;;  %v1129_v27 = vsub.f32 %v1048_v16, %v2076_v20  ;;  %v1136_v28 = vand.u32 4294901760, %v2082_v22  ;;  %572 = vmatpush1.msra.mxu0 %v2064_v11  ;;  %v1523_v49 = vld [vmem:[%s2243_s7] sm:$0xff] }
  0x22   : > { %1053 = vmatpush1.msra.mxu1 %v2066_v12  ;;  %v638_v31 = vand.u32 4294901760, %v2085_v23  ;;  %v649_v33 = vand.u32 4294901760, %v2093_v25  ;;  %v1531_v50 = vld [vmem:[%s2244_s8] sm:$0xff] }
  0x23   : > { %v1119_v32 = vand.u32 4294901760, %v2088_v24  ;;  %v656_v34 = vsub.f32 %v2079_v21, %v655_v26  ;;  %v1130_v35 = vand.u32 4294901760, %v1129_v27  ;;  %v1137_v36 = vsub.f32 %v2082_v22, %v1136_v28  ;;  %1038 = vperm.xlu0 %1852, %v1035_v48   ;;  %v1541_v51 = vld [vmem:[%s2245_s9] sm:$0xff] }
  0x24   : > { %v639_v38 = vsub.f32 %v2085_v23, %v638_v31  ;;  %v650_v40 = vsub.f32 %v2093_v25, %v649_v33  ;;  %1526 = vperm.xlu1 %1853, %v1523_v49   ;;  %v1551_v52 = vld [vmem:[%s2246_s10] sm:$0xff] }
  0x25   : > { %v1120_v39 = vsub.f32 %v2088_v24, %v1119_v32  ;;  %v1131_v41 = vsub.f32 %v1129_v27, %v1130_v35  ;;  %v657_v44 = vand.u32 4294901760, %v656_v34  ;;  %v1138_v45 = vand.u32 4294901760, %v1137_v36  ;;  %v1571_v53 = vld [vmem:[#allocation2] sm:$0x1]  ;;  %v1606_v49 = vld [vmem:[#allocation3] sm:$0x1] }
  0x26   : > { %v640_v42 = vand.u32 4294901760, %v639_v38  ;;  %v651_v46 = vand.u32 4294901760, %v650_v40 }
  0x27   : > { %v1121_v43 = vand.u32 4294901760, %v1120_v39  ;;  %v1132_v47 = vand.u32 4294901760, %v1131_v41  ;;  %1534 = vperm.xlu0 %1852, %v1531_v50  }
  0x28   : > { %641 = vmatmul.mubr.f32.vlgmr.msra.gmra.mrb[0].mxu0 %v640_v42  ;;  %652 = vmatprep.subr.mxu0 %v651_v46 }
  0x29   : > { %1122 = vmatmul.mubr.f32.vlgmr.msra.gmra.mrb[0].mxu1 %v1121_v43  ;;  %1133 = vmatprep.subr.mxu1 %v1132_v47 }
  0x2a   : > { %658 = vmatpush1.msra.mxu0 %v657_v44  ;;  %1139 = vmatpush1.msra.mxu1 %v1138_v45 }
  0x2b   : > { %721 = vmatprep.mubr.f32.mxu0 %v1941_v8  ;;  %1202 = vmatprep.mubr.f32.mxu1 %v1941_v8 }
  0x2c   : > { %731 = vmatprep.subr.mxu0 %v2093_v25  ;;  %1212 = vmatprep.subr.mxu1 %v1129_v27 }
  0x2d   : > { %1544 = vperm.xlu1 %1853, %v1541_v51   ;;  %1554 = vperm.xlu0 %1852, %v1551_v52   ;;  %v1613_v51 = vld [vmem:[#allocation5] sm:$0x1] }
  0x30   : > { %723 = vmatmul.mubr.f32.vlgmr.msra.gmra.mrb[0].mxu0 %v2070_v17 }
  0x31   : > { %1204 = vmatmul.mubr.f32.vlgmr.msra.gmra.mrb[0].mxu1 %v2072_v18  ;;  %734 = vmatpush1.msra.mxu0 %v2079_v21 }
  0x32   : > { %1215 = vmatpush1.msra.mxu1 %v2082_v22  ;;  %797 = vmatprep.mubr.f32.mxu0 %v1941_v8 }
  0x33   : > { %1278 = vmatprep.mubr.f32.mxu1 %v1941_v8  ;;  %807 = vmatprep.subr.mxu0 %v2074_v19 }
  0x34   : > { %1288 = vmatprep.subr.mxu1 %v2076_v20  ;;  %1574 = vperm.xlu1 %1853, %v1571_v53  }
  0x38   : > { %800 = vmatmul.mubr.f32.vlgmr.msra.gmra.mrb[0].mxu0 %v2085_v23 }
  0x39   : > { %1281 = vmatmul.mubr.f32.vlgmr.msra.gmra.mrb[0].mxu1 %v2088_v24  ;;  %809 = vmatpush1.msra.mxu0 %v2064_v11 }
  0x3a   : > { %1290 = vmatpush1.msra.mxu1 %v2066_v12  ;;  %872 = vmatprep.mubr.f32.mxu0 %v1941_v8 }
  0x3b   : > { %1353 = vmatprep.mubr.f32.mxu1 %v1941_v8  ;;  %885 = vmatprep.subr.mxu0 %v649_v33 }
  0x3c   : > { %1366 = vmatprep.subr.mxu1 %v1130_v35 }
  0x40   : > { %876 = vmatmul.mubr.f32.vlgmr.msra.gmra.mrb[0].mxu0 %v638_v31 }
  0x41   : > { %1357 = vmatmul.mubr.f32.vlgmr.msra.gmra.mrb[0].mxu1 %v1119_v32  ;;  %889 = vmatpush1.msra.mxu0 %v655_v26  ;;  %v1943_v26 = vmov 1966171168  }
  0x42   : > { %1370 = vmatpush1.msra.mxu1 %v1136_v28  ;;  %952 = vmatprep.mubr.f32.mxu0 %v1941_v8  ;;  %v1587_v27 = vunpack.c.l.s4 %v1943_v26 }
  0x43   : > { %1433 = vmatprep.mubr.f32.mxu1 %v1941_v8  ;;  %961 = vmatprep.subr.mxu0 %v2074_v19 }
  0x44   : > { %1442 = vmatprep.subr.mxu1 %v2076_v20  ;;  %v1588_v34 = vunpack.c.0.s8 %v1587_v27 }
  0x48   : > { %954 = vmatmul.mubr.f32.vlgmr.msra.gmra.mrb[0].mxu0 %v2070_v17 }
  0x49   : > { %1435 = vmatmul.mubr.f32.vlgmr.msra.gmra.mrb[0].mxu1 %v2072_v18  ;;  %963 = vmatpush1.msra.mxu0 %v2064_v11 }
  0x4a   : > { %1444 = vmatpush1.msra.mxu1 %v2066_v12  ;;  %1026 = vmatprep.mubr.f32.mxu0 %v1941_v8 }
  0x4b   : > { %1507 = vmatprep.mubr.f32.mxu1 %v1941_v8 }
  0x50   : > { %1028 = vmatmul.mubr.f32.vlgmr.msra.gmra.mrb[0].mxu0 %v2070_v17 }
  0x51   : > { %1509 = vmatmul.mubr.f32.vlgmr.msra.gmra.mrb[0].mxu1 %v2072_v18  ;;  %v1577_v18 = vlaneseq }
  0x53   : > { %v1578_v22 = vshrl.u32 %v1577_v18, 7  ;;  %vm1603_vm3 = vcmp.lt.s32.totalorder %v1577_v18, 256 }
  0x55   : > { %v1579_v29 = vsub.s32 0, %v1578_v22  ;;  %v1591_v40 = vsub.s32 %v1588_v34, %v1578_v22 }
  0x9e   : > { %v556_v54 = vpop.permute.xlu0 %555 }
  0x9f   : > { %v1519_v55 = vpop.permute.xlu1 %1518 }
  0xa2   : > { %v1039_v56 = vpop.permute.xlu0 %1038 }
  0xa3   : > { %v1527_v63 = vpop.permute.xlu1 %1526 }
  0xa6   : > { %v1535_v3 = vpop.permute.xlu0 %1534 }
  0xac   : > { %v1545_v10 = vpop.permute.xlu1 %1544  ;;  %v1555_v15 = vpop.permute.xlu0 %1554 }
  0xb3   : > { %v1575_v31 = vpop.permute.xlu1 %1574 }
  0xb4   : > { %v1580_v37 = vrot.slane %v1575_v31, %v1579_v29 }
 0x123   : > { %v1029_v57 = vpop.f32.mrb[0].mxu0 }
 0x124   : > { %v1510_v58 = vpop.f32.mrb[0].mxu1  ;;  %v1786_v59 = vadd.f32 %v1029_v57, %v556_v54  ;;  %v1031_v61 = vpop.f32.mrb[1].mxu0 }
 0x125   : > { %v1788_v60 = vadd.f32 %v1510_v58, %v1039_v56  ;;  %v1512_v62 = vpop.f32.mrb[1].mxu1  ;;  %v1787_v0 = vadd.f32 %v1031_v61, %v556_v54 }
 0x126   : > { %v1789_v1 = vadd.f32 %v1512_v62, %v1039_v56  ;;  %v1521_v2 = vmul.f32 %v1786_v59, %v1519_v55 }
 0x127   : > { %v1522_v4 = vmul.f32 %v1787_v0, %v1519_v55  ;;  %v1537_v6 = vmul.f32 %v1788_v60, %v1535_v3 }
 0x128   : > { %v1529_v5 = vadd.f32 %v1527_v63, %v1521_v2  ;;  %v1538_v8 = vmul.f32 %v1789_v1, %v1535_v3 }
 0x129   : > { %v1530_v7 = vadd.f32 %v1527_v63, %v1522_v4 }
 0x12a   : > { %v1539_v9 = vadd.f32 %v1537_v6, %v1529_v5 }
 0x12b   : > { %v1540_v11 = vadd.f32 %v1538_v8, %v1530_v7 }
 0x12c   : > { %v1547_v12 = vadd.f32 %v1545_v10, %v1539_v9 }
 0x12d   : > { %v1548_v13 = vadd.f32 %v1545_v10, %v1540_v11 }
 0x12e   : > { %v1549_v14 = vmax.f32 %v1547_v12, 0.0 }
 0x12f   : > { %v1550_v16 = vmax.f32 %v1548_v13, 0.0 }
 0x130   : > { %v1557_v17 = vmul.f32 %v1555_v15, %v1549_v14 }
 0x131   : > { %v1558_v19 = vmul.f32 %v1555_v15, %v1550_v16 }
 0x132   : > { %v1559_v20 = vrot.slane %v1557_v17, 4 }
 0x133   : > { %v1565_v21 = vrot.slane %v1558_v19, 4 }
 0x134   : > { %v1560_v23 = vadd.f32 %v1559_v20, %v1557_v17 }
 0x135   : > { %v1566_v24 = vadd.f32 %v1565_v21, %v1558_v19 }
 0x136   : > { %v1561_v25 = vrot.slane %v1560_v23, 2 }
 0x137   : > { %v1567_v28 = vrot.slane %v1566_v24, 2 }
 0x138   : > { %v1562_v30 = vadd.f32 %v1561_v25, %v1560_v23 }
 0x139   : > { %v1568_v32 = vadd.f32 %v1567_v28, %v1566_v24 }
 0x13a   : > { %v1563_v33 = vrot.slane %v1562_v30, 1 }
 0x13b   : > { %v1569_v35 = vrot.slane %v1568_v32, 1 }
 0x13c   : > { %v1564_v36 = vadd.f32 %v1563_v33, %v1562_v30 }
 0x13d   : > { %v1570_v38 = vadd.f32 %v1569_v35, %v1568_v32 }
 0x13e   : > { %v1581_v39 = vadd.f32 %v1580_v37, %v1564_v36 }
 0x13f   : > { %v1582_v41 = vadd.f32 %v1580_v37, %v1570_v38 }
 0x140   : > { %v1614_v42 = vmul.f32 %v1581_v39, %v1581_v39 }
 0x141   : > { %v1585_v43 = vcombine.low %v1581_v39, %v1582_v41  ;;  %v1607_v44 = vadd.f32 %v1582_v41, %v1581_v39  ;;  %v1615_v45 = vmul.f32 %v1582_v41, %v1582_v41 }
 0x143   : > { %v1592_v46 = vrot.slane %v1585_v43, %v1591_v40  ;;  %1608 = vadd.xlane.f32.xlu0 %v1607_v44  ;;  %v1616_v47 = vadd.f32 %v1615_v45, %v1614_v42 }
 0x145   : > { %v1599_v48 = vrot.slane %v1592_v46, %v1591_v40  ;;  %1617 = vadd.xlane.f32.xlu1 %v1616_v47 }
 0x147   : > { %1605 = vst.msk [vmem:[%s2052_s29] sm:$0x3] %vm1603_vm3, %v1599_v48  ;;  %s1856_s29 = scalar_lea.vmem %s1641_s24, 16 }
 0x148   : > { %p1857_p7 = scmp.ne.s32.totalorder %s1641_s24, %s1856_s29  ;;  %p1864_p11 = scmp.lt.s32.totalorder %s1862_s11, %s1856_s29 }
 0x14a   : > { %p1858_p8 = pnand %p1857_p7, %p2169_p6  ;;  %p1865_p12 = por %p1864_p11, %p1863_p10 }
 0x14c   : > { %p1859_p9 = pneg %p1858_p8 }
 0x14e   : > { %p1866_p13 = pnand %p1865_p12, %p1859_p9 }
 0x1d0   : > { %v1609_v50 = vpop.xlane.xlu0 %1608 }
 0x1d1   : > { %v1610_v52 = vadd.f32 %v1609_v50, %v1606_v49 }
 0x1d2   : > { %v1618_v53 = vpop.xlane.xlu1 %1617 }
 0x1d3   : > { %v1619_v54 = vadd.f32 %v1618_v53, %v1613_v51  ;;  %1612 = vst.msk [vmem:[#allocation3] sm:$0x1] %vm1611_vm4, %v1610_v52 }
 0x1d4   : > { %1869 = shalt.err (!%p1866_p13)
}
 0x1d5   : > { %s1870_s15 = scalar_lea.hbm %s2249_s13, 16 }
 0x1d6   : > { %p1871_p0 = scmp.ne.s32.totalorder %s2249_s13, %s1870_s15  ;;  %p1876_p3 = scmp.lt.u32.totalorder %s1870_s15, %s2249_s13 }
 0x1d8   : > { %p1872_p1 = pnand %p1871_p0, %p2169_p6 }
 0x1da   : > { %p1873_p2 = pneg %p1872_p1 }
 0x1dc   : > { %p1878_p4 = pnand %p1876_p3, %p1873_p2 }
 0x1de   : > { %1881 = shalt.err (!%p1878_p4)
}
 0x1df   : > { %1811 = dma.vmem_to_hbm [thread:$0]  (%p2169_p6), %s1641_s24, 16, %s2249_s13, [#allocation4]   ;;  %1620 = vst.msk [vmem:[#allocation5] sm:$0x1] %vm1611_vm4, %v1619_v54 }
 0x1e0   : > { %s1882_s29 = scalar_lea.vmem %s2174_s27, 16  ;;  %s1888_s11 = scalar_lea.vmem %s2174_s27, 32 }
 0x1e1   : > { %p1883_p5 = scmp.ne.s32.totalorder %s2174_s27, %s1882_s29  ;;  %p1889_p9 = scmp.lt.s32.totalorder %s2174_s27, %s2174_s27 }
 0x1e2   : > { %p1890_p10 = scmp.lt.s32.totalorder %s1888_s11, %s1882_s29 }
 0x1e3   : > { %p1884_p7 = pnand %p1883_p5, %p2169_p6 }
 0x1e4   : > { %p1891_p11 = por %p1890_p10, %p1889_p9 }
 0x1e5   : > { %p1885_p8 = pneg %p1884_p7 }
 0x1e7   : > { %p1892_p12 = pnand %p1891_p11, %p1885_p8 }
 0x1e9   : > { %1895 = shalt.err (!%p1892_p12)
}
 0x1ea   : > { %s1896_s15 = scalar_lea.hbm %s2250_s14, 16 }
 0x1eb   : > { %p1897_p13 = scmp.ne.s32.totalorder %s2250_s14, %s1896_s15  ;;  %p1902_p2 = scmp.lt.u32.totalorder %s1896_s15, %s2250_s14 }
 0x1ed   : > { %p1898_p0 = pnand %p1897_p13, %p2169_p6 }
 0x1ef   : > { %p1899_p1 = pneg %p1898_p0 }
 0x1f1   : > { %p1904_p3 = pnand %p1902_p2, %p1899_p1 }
 0x1f3   : > { %1907 = shalt.err (!%p1904_p3)
}
 0x1f4   : > { %1813 = dma.vmem_to_hbm [thread:$0]  (%p2169_p6), %s2174_s27, 16, %s2250_s14, [#allocation6]  }
 0x1f5   : > { %1921 = dma.done.wait (%p2169_p6), [#allocation4], 16  }
 0x1f6   : > { %1923 = vsyncadd (%p2169_p6), [#allocation4], 4294967280 }
 0x1f7   : > { %1925 = dma.done.wait (%p2169_p6), [#allocation6], 16  }
 0x1f8   : > { %1927 = vsyncadd (%p2169_p6), [#allocation6], 4294967280 }
 0x1f9 PF: > { %s29_s17 = sadd.s32 1, %s1938_s17   ;;  %s2252_s15 = smov %s1934_s16 }
 0x1fa   : > { %p26_p4 = scmp.ge.s32.totalorder %s29_s17, 4   ;;  %s2253_s16 = smov %s2255_s18 }
 0x1fc   :  { %28 = sbr.rel (!%p26_p4) target bundleno = 6 (0x6), region = 122 }
 0x203   :  { %1679 = vsyncpa [#allocation4], 1 }
 0x204   :  { %1681 = vsyncpa [#allocation4 + $0x1], 1 }
 0x205   :  { %1682 = vsyncpa [#allocation6], 1 }

</bundles_post_ra>
